<compile_context>
chip_gen: v7x
topology: tpu7x:2x2x1
jax: 0.10.0
libtpu: 0.0.40
codegen_flags: <defaults>
</compile_context>

<pallas_src>
import math
from functools import partial

import jax
import jax.numpy as jnp
from jax.experimental import pallas as pl
from jax.experimental.pallas import tpu as pltpu


# ------------------------------ Pallas kernel ------------------------------ #

def _fused_model_kernel(h0_ref, lens_ref,
                        wqkv_ref, wo_ref, bo_ref,
                        w1_ref, b1_ref, w2_ref, b2_ref,
                        g1_ref, be1_ref, g2_ref, be2_ref,
                        embT_ref, gf_ref, bf_ref,
                        logits_ref,
                        h_ref,
                        *, B, L, num_heads, head_dim, causal, eps, scale):
    """One grid step == one decoder layer; last step also does LN_f + tied head.

    h_ref (VMEM scratch, (B*L, E) f32) is the residual stream, resident across
    the whole layer grid.  All matmuls run with the batch flattened into M.
    """
    l = pl.program_id(0)
    n_layers = pl.num_programs(0)
    M, E = h_ref.shape
    D = num_heads * head_dim

    # ---- load the embedded input into the resident VMEM accumulator (once) ----
    @pl.when(l == 0)
    def _():
        h_ref[...] = h0_ref[...].reshape(M, E)

    x = h_ref[...]                                        # (M, E) f32

    # ---- LN1 (f32 stats) ----
    mu = jnp.mean(x, axis=-1, keepdims=True)
    var = jnp.mean(jnp.square(x - mu), axis=-1, keepdims=True)
    xn = (x - mu) * jax.lax.rsqrt(var + eps) * g1_ref[0] + be1_ref[0]

    # ---- fused QKV projection (bf16 MXU, f32 accumulate); qkv_bias=False ----
    qkv = jnp.dot(xn.astype(jnp.bfloat16), wqkv_ref[0],
                  preferred_element_type=jnp.float32)     # (M, 3D)
    q = (qkv[:, :D] * scale).astype(jnp.bfloat16).reshape(B, L, D)  # fold 1/sqrt(hd)
    k = qkv[:, D:2 * D].astype(jnp.bfloat16).reshape(B, L, D)
    v = qkv[:, 2 * D:].astype(jnp.bfloat16).reshape(B, L, D)

    # ---- causal + key-padding mask, built in-kernel, batched over B ----
    row = jax.lax.broadcasted_iota(jnp.int32, (B, L, L), 1)
    col = jax.lax.broadcasted_iota(jnp.int32, (B, L, L), 2)
    lens = lens_ref[...].reshape(B, 1, 1)                 # (B,1,1) int32
    valid = col < lens
    if causal:
        valid = jnp.logical_and(valid, col <= row)

    # ---- attention: per-head (static unroll), batched over B via einsum.
    #      Each head's context is projected against its Wo slice and summed,
    #      so no lane-narrow head concatenate / masked store is ever emitted. ----
    wo = wo_ref[0]                                        # (D, E) bf16
    attn = jnp.zeros((M, E), jnp.float32)
    for h in range(num_heads):
        sl = slice(h * head_dim, (h + 1) * head_dim)
        qh, kh, vh = q[:, :, sl], k[:, :, sl], v[:, :, sl]          # (B, L, hd)
        s = jnp.einsum('bqd,bkd->bqk', qh, kh,
                       preferred_element_type=jnp.float32)           # (B, L, L)
        s = jnp.where(valid, s, -1e9)
        m = jnp.max(s, axis=-1, keepdims=True)
        e = jnp.exp(s - m)
        inv = pl.reciprocal(jnp.sum(e, axis=-1, keepdims=True), approx=True)
        ctx = jnp.einsum('bqk,bkd->bqd', e.astype(jnp.bfloat16), vh,
                         preferred_element_type=jnp.float32) * inv    # (B, L, hd)
        attn = attn + jnp.dot(ctx.reshape(M, head_dim).astype(jnp.bfloat16),
                              wo[sl, :], preferred_element_type=jnp.float32)

    h1 = x + attn + bo_ref[0]                             # dropout = identity (eval)

    # ---- LN2 + FFN (W1 -> GELU -> W2) + residual; intermediate stays in VMEM ----
    mu2 = jnp.mean(h1, axis=-1, keepdims=True)
    var2 = jnp.mean(jnp.square(h1 - mu2), axis=-1, keepdims=True)
    hn = (h1 - mu2) * jax.lax.rsqrt(var2 + eps) * g2_ref[0] + be2_ref[0]

    f = jnp.dot(hn.astype(jnp.bfloat16), w1_ref[0],
                preferred_element_type=jnp.float32) + b1_ref[0]       # (M, F)
    f = jax.nn.gelu(f, approximate=True)                              # tanh GELU -> EUP
    h2 = h1 + jnp.dot(f.astype(jnp.bfloat16), w2_ref[0],
                      preferred_element_type=jnp.float32) + b2_ref[0]

    h_ref[...] = h2                                       # residual stream stays in VMEM

    # ---- final LN + weight-tied head, only on the last layer iteration ----
    @pl.when(l == n_layers - 1)
    def _():
        muf = jnp.mean(h2, axis=-1, keepdims=True)
        varf = jnp.mean(jnp.square(h2 - muf), axis=-1, keepdims=True)
        hf = (h2 - muf) * jax.lax.rsqrt(varf + eps) * gf_ref[...] + bf_ref[...]
        logits = jnp.dot(hf.astype(jnp.bfloat16), embT_ref[...],
                         preferred_element_type=jnp.float32)          # (M, V)
        logits_ref[...] = logits.reshape(B, L, logits.shape[-1])


# ----------------------------- Pallas wrapper ------------------------------ #

def _const_spec(shape):
    nd = len(shape)
    return pl.BlockSpec(shape, lambda l, _nd=nd: (0,) * _nd)


def _layer_spec(shape):
    nd = len(shape)
    return pl.BlockSpec((1,) + shape, lambda l, _nd=nd: (l,) + (0,) * _nd)


@partial(jax.jit, static_argnames=("num_heads", "causal"))
def tiny_story_forward(params, x_tokens, x_lens, num_heads, causal=True):
    B, L = x_tokens.shape
    V, E = params["tok_emb"].shape
    NL = params["wqkv"].shape[0]
    D = params["wqkv"].shape[2] // 3
    F = params["w1"].shape[2]
    head_dim = D // num_heads
    scale = 1.0 / math.sqrt(head_dim)

    # Plain-JAX glue: embedding gather + learned positional add (once), and a
    # one-time transpose of the tied embedding so the head matmul is canonical.
    h0 = params["tok_emb"][x_tokens].astype(jnp.float32) + params["pos_emb"][:L][None]
    emb_T = params["tok_emb"].T                            # (E, V) bf16
    lens2d = x_lens.astype(jnp.int32).reshape(B, 1)

    kernel = partial(_fused_model_kernel, B=B, L=L, num_heads=num_heads,
                     head_dim=head_dim, causal=causal, eps=1e-5, scale=scale)

    return pl.pallas_call(
        kernel,
        grid=(NL,),
        in_specs=[
            _const_spec((B, L, E)),      # h0 (read once at l==0)
            _const_spec((B, 1)),         # x_lens (int32)
            _layer_spec((E, 3 * D)),     # Wqkv  (bf16, stacked per layer)
            _layer_spec((D, E)),         # Wo    (bf16)
            _layer_spec((1, E)),         # bo
            _layer_spec((E, F)),         # W1    (bf16)
            _layer_spec((1, F)),         # b1
            _layer_spec((F, E)),         # W2    (bf16)
            _layer_spec((1, E)),         # b2
            _layer_spec((1, E)),         # ln1_g
            _layer_spec((1, E)),         # ln1_b
            _layer_spec((1, E)),         # ln2_g
            _layer_spec((1, E)),         # ln2_b
            _const_spec((E, V)),         # tied embedding, pre-transposed (bf16)
            _const_spec((1, E)),         # ln_f_g
            _const_spec((1, E)),         # ln_f_b
        ],
        out_specs=pl.BlockSpec((B, L, V), lambda l: (0, 0, 0)),
        out_shape=jax.ShapeDtypeStruct((B, L, V), jnp.float32),
        scratch_shapes=[pltpu.VMEM((B * L, E), jnp.float32)],   # resident residual stream
        compiler_params=pltpu.CompilerParams(dimension_semantics=("arbitrary",)),
    )(h0, lens2d,
      params["wqkv"], params["wo"], params["bo"],
      params["w1"], params["b1"], params["w2"], params["b2"],
      params["ln1_g"], params["ln1_b"], params["ln2_g"], params["ln2_b"],
      emb_T, params["ln_f_g"], params["ln_f_b"])


# ----------------------------- Parameter init ------------------------------ #

def init_params(key, num_layers, vocab, E, d_out, ffn, ctx_len):
    ks = jax.random.split(key, 6)

    def nrm(k, shape):
        return jax.random.normal(k, shape, jnp.float32) * 0.02

    return {
        "tok_emb": nrm(ks[0], (vocab, E)).astype(jnp.bfloat16),     # tied w/ output head
        "pos_emb": nrm(ks[1], (ctx_len, E)),
        "ln_f_g": jnp.ones((1, E), jnp.float32),
        "ln_f_b": jnp.zeros((1, E), jnp.float32),
        # per-layer weights stacked along a leading (num_layers,) axis
        "wqkv": nrm(ks[2], (num_layers, E, 3 * d_out)).astype(jnp.bfloat16),
        "wo":   nrm(ks[3], (num_layers, d_out, E)).astype(jnp.bfloat16),
        "bo":   jnp.zeros((num_layers, 1, E), jnp.float32),
        "w1":   nrm(ks[4], (num_layers, E, ffn)).astype(jnp.bfloat16),
        "b1":   jnp.zeros((num_layers, 1, ffn), jnp.float32),
        "w2":   nrm(ks[5], (num_layers, ffn, E)).astype(jnp.bfloat16),
        "b2":   jnp.zeros((num_layers, 1, E), jnp.float32),
        "ln1_g": jnp.ones((num_layers, 1, E), jnp.float32),
        "ln1_b": jnp.zeros((num_layers, 1, E), jnp.float32),
        "ln2_g": jnp.ones((num_layers, 1, E), jnp.float32),
        "ln2_b": jnp.zeros((num_layers, 1, E), jnp.float32),
    }


# ---------------------------------- Main ----------------------------------- #

if __name__ == "__main__":
    # Small but lane-dense hyperparameters (multiples of 128 on matmul dims).
    num_layers, vocab_size, embed_size = 2, 256, 128
    d_out_n_heads, num_heads, ffn_hidden_dim = 128, 4, 256
    context_length, PAD_token = 64, 0
    B, L = 2, 16

    root = jax.random.PRNGKey(0)
    pk, tk = jax.random.split(root)
    params = init_params(pk, num_layers, vocab_size, embed_size,
                         d_out_n_heads, ffn_hidden_dim, context_length)

    x_lens = jnp.array([16, 11], dtype=jnp.int32)
    tokens = jax.random.randint(tk, (B, L), 1, vocab_size, dtype=jnp.int32)
    pos = jnp.arange(L)
    tokens = jnp.where(pos[None, :] < x_lens[:, None], tokens, PAD_token)

    logits = tiny_story_forward(params, tokens, x_lens,
                                num_heads=num_heads, causal=True)
    logits = jax.block_until_ready(logits)

    assert logits.shape == (B, L, vocab_size)
    assert bool(jnp.all(jnp.isfinite(logits)))
    print("KERNEL_OK")
</pallas_src>

<mosaic_0001>
module attributes {stable_mosaic.version = 11 : i64} {
  func.func @_fused_model_kernel(%arg0: i32, %arg1: memref<2x16x128xf32, #tpu.memory_space<vmem>>, %arg2: memref<2x1xi32, #tpu.memory_space<vmem>>, %arg3: memref<1x128x384xbf16, #tpu.memory_space<vmem>>, %arg4: memref<1x128x128xbf16, #tpu.memory_space<vmem>>, %arg5: memref<1x1x128xf32, #tpu.memory_space<vmem>>, %arg6: memref<1x128x256xbf16, #tpu.memory_space<vmem>>, %arg7: memref<1x1x256xf32, #tpu.memory_space<vmem>>, %arg8: memref<1x256x128xbf16, #tpu.memory_space<vmem>>, %arg9: memref<1x1x128xf32, #tpu.memory_space<vmem>>, %arg10: memref<1x1x128xf32, #tpu.memory_space<vmem>>, %arg11: memref<1x1x128xf32, #tpu.memory_space<vmem>>, %arg12: memref<1x1x128xf32, #tpu.memory_space<vmem>>, %arg13: memref<1x1x128xf32, #tpu.memory_space<vmem>>, %arg14: memref<128x256xbf16, #tpu.memory_space<vmem>>, %arg15: memref<1x128xf32, #tpu.memory_space<vmem>>, %arg16: memref<1x128xf32, #tpu.memory_space<vmem>>, %arg17: memref<2x16x256xf32, #tpu.memory_space<vmem>>, %arg18: memref<32x128xf32, #tpu.memory_space<vmem>>) attributes {dimension_semantics = [#tpu.dimension_semantics<arbitrary>], iteration_bounds = array<i64: 2>, scalar_prefetch = 0 : i64, scratch_operands = 1 : i64, tpu.core_type = #tpu.core_type<tc>, window_params = [{pipeline_mode = #tpu.pipeline_mode<synchronous>, transform_indices = @transform_0, window_bounds = array<i64: 2, 16, 128>}, {pipeline_mode = #tpu.pipeline_mode<synchronous>, transform_indices = @transform_1, window_bounds = array<i64: 2, 1>}, {transform_indices = @transform_2, window_bounds = array<i64: 1, 128, 384>}, {transform_indices = @transform_3, window_bounds = array<i64: 1, 128, 128>}, {transform_indices = @transform_4, window_bounds = array<i64: 1, 1, 128>}, {transform_indices = @transform_5, window_bounds = array<i64: 1, 128, 256>}, {transform_indices = @transform_6, window_bounds = array<i64: 1, 1, 256>}, {transform_indices = @transform_7, window_bounds = array<i64: 1, 256, 128>}, {transform_indices = @transform_8, window_bounds = array<i64: 1, 1, 128>}, {transform_indices = @transform_9, window_bounds = array<i64: 1, 1, 128>}, {transform_indices = @transform_10, window_bounds = array<i64: 1, 1, 128>}, {transform_indices = @transform_11, window_bounds = array<i64: 1, 1, 128>}, {transform_indices = @transform_12, window_bounds = array<i64: 1, 1, 128>}, {pipeline_mode = #tpu.pipeline_mode<synchronous>, transform_indices = @transform_13, window_bounds = array<i64: 128, 256>}, {pipeline_mode = #tpu.pipeline_mode<synchronous>, transform_indices = @transform_14, window_bounds = array<i64: 1, 128>}, {pipeline_mode = #tpu.pipeline_mode<synchronous>, transform_indices = @transform_15, window_bounds = array<i64: 1, 128>}, {pipeline_mode = #tpu.pipeline_mode<synchronous>, transform_indices = @transform_16, window_bounds = array<i64: 2, 16, 256>}]} {
    %c0_i32 = arith.constant 0 : i32
    %0 = arith.cmpi eq, %arg0, %c0_i32 : i32
    %1 = arith.extui %0 : i1 to i32
    %c0_i32_0 = arith.constant 0 : i32
    %2 = arith.cmpi ne, %1, %c0_i32_0 : i32
    scf.if %2 {
      %c0_82 = arith.constant 0 : index
      %c0_83 = arith.constant 0 : index
      %c0_84 = arith.constant 0 : index
      %213 = vector.load %arg1[%c0_82, %c0_83, %c0_84] : memref<2x16x128xf32, #tpu.memory_space<vmem>>, vector<2x16x128xf32>
      %214 = vector.shape_cast %213 : vector<2x16x128xf32> to vector<32x128xf32>
      %c0_85 = arith.constant 0 : index
      %c0_86 = arith.constant 0 : index
      %215 = vector.load %arg18[%c0_85, %c0_86] : memref<32x128xf32, #tpu.memory_space<vmem>>, vector<32x128xf32>
      tpu.vector_store %arg18[%c0_85, %c0_86], %214 {strides = array<i32>} : memref<32x128xf32, #tpu.memory_space<vmem>>, vector<32x128xf32>,
    } else {
    }
    %c0 = arith.constant 0 : index
    %c0_1 = arith.constant 0 : index
    %3 = vector.load %arg18[%c0, %c0_1] : memref<32x128xf32, #tpu.memory_space<vmem>>, vector<32x128xf32>
    %cst = arith.constant dense<0.000000e+00> : vector<32xf32>
    %4 = vector.multi_reduction <add>, %3, %cst [1] : vector<32x128xf32> to vector<32xf32>
    %5 = vector.shape_cast %4 : vector<32xf32> to vector<32x1xf32>
    %cst_2 = arith.constant 1.280000e+02 : f32
    %6 = vector.broadcast %cst_2 : f32 to vector<32x1xf32>
    %7 = arith.divf %5, %6 : vector<32x1xf32>
    %8 = vector.broadcast %7 : vector<32x1xf32> to vector<32x128xf32>
    %9 = arith.subf %3, %8 : vector<32x128xf32>
    %10 = arith.mulf %9, %9 : vector<32x128xf32>
    %cst_3 = arith.constant dense<0.000000e+00> : vector<32xf32>
    %11 = vector.multi_reduction <add>, %10, %cst_3 [1] : vector<32x128xf32> to vector<32xf32>
    %12 = vector.shape_cast %11 : vector<32xf32> to vector<32x1xf32>
    %cst_4 = arith.constant 1.280000e+02 : f32
    %13 = vector.broadcast %cst_4 : f32 to vector<32x1xf32>
    %14 = arith.divf %12, %13 : vector<32x1xf32>
    %15 = vector.broadcast %7 : vector<32x1xf32> to vector<32x128xf32>
    %16 = arith.subf %3, %15 : vector<32x128xf32>
    %cst_5 = arith.constant 9.99999974E-6 : f32
    %17 = vector.broadcast %cst_5 : f32 to vector<32x1xf32>
    %18 = arith.addf %14, %17 : vector<32x1xf32>
    %19 = math.rsqrt %18 : vector<32x1xf32>
    %20 = vector.broadcast %19 : vector<32x1xf32> to vector<32x128xf32>
    %21 = arith.mulf %16, %20 : vector<32x128xf32>
    %c0_6 = arith.constant 0 : index
    %c0_7 = arith.constant 0 : index
    %c0_8 = arith.constant 0 : index
    %22 = vector.load %arg10[%c0_6, %c0_7, %c0_8] : memref<1x1x128xf32, #tpu.memory_space<vmem>>, vector<1x1x128xf32>
    %23 = vector.shape_cast %22 : vector<1x1x128xf32> to vector<1x128xf32>
    %24 = vector.broadcast %23 : vector<1x128xf32> to vector<32x128xf32>
    %25 = arith.mulf %21, %24 : vector<32x128xf32>
    %c0_9 = arith.constant 0 : index
    %c0_10 = arith.constant 0 : index
    %c0_11 = arith.constant 0 : index
    %26 = vector.load %arg11[%c0_9, %c0_10, %c0_11] : memref<1x1x128xf32, #tpu.memory_space<vmem>>, vector<1x1x128xf32>
    %27 = vector.shape_cast %26 : vector<1x1x128xf32> to vector<1x128xf32>
    %28 = vector.broadcast %27 : vector<1x128xf32> to vector<32x128xf32>
    %29 = arith.addf %25, %28 : vector<32x128xf32>
    %30 = arith.truncf %29 : vector<32x128xf32> to vector<32x128xbf16>
    %c0_12 = arith.constant 0 : index
    %c0_13 = arith.constant 0 : index
    %c0_14 = arith.constant 0 : index
    %31 = vector.load %arg3[%c0_12, %c0_13, %c0_14] : memref<1x128x384xbf16, #tpu.memory_space<vmem>>, vector<1x128x384xbf16>
    %32 = vector.shape_cast %31 : vector<1x128x384xbf16> to vector<128x384xbf16>
    %cst_15 = arith.constant dense<0.000000e+00> : vector<32x384xf32>
    %33 = tpu.matmul %30, %32, %cst_15 {dimension_numbers = #tpu.dot_dimension_numbers<[1], [0], [0], [1], [0, 0, 1, 1], [], []>} : vector<32x128xbf16>, vector<128x384xbf16>, vector<32x384xf32> -> vector<32x384xf32>
    %34 = vector.extract_strided_slice %33 {offsets = [0, 0], sizes = [32, 128], strides = [1, 1]} : vector<32x384xf32> to vector<32x128xf32>
    %cst_16 = arith.constant 0.176776692 : f32
    %35 = vector.broadcast %cst_16 : f32 to vector<32x128xf32>
    %36 = arith.mulf %34, %35 : vector<32x128xf32>
    %37 = arith.truncf %36 : vector<32x128xf32> to vector<32x128xbf16>
    %38 = vector.shape_cast %37 : vector<32x128xbf16> to vector<2x16x128xbf16>
    %39 = vector.extract_strided_slice %33 {offsets = [0, 128], sizes = [32, 128], strides = [1, 1]} : vector<32x384xf32> to vector<32x128xf32>
    %40 = arith.truncf %39 : vector<32x128xf32> to vector<32x128xbf16>
    %41 = vector.shape_cast %40 : vector<32x128xbf16> to vector<2x16x128xbf16>
    %42 = vector.extract_strided_slice %33 {offsets = [0, 256], sizes = [32, 128], strides = [1, 1]} : vector<32x384xf32> to vector<32x128xf32>
    %43 = arith.truncf %42 : vector<32x128xf32> to vector<32x128xbf16>
    %44 = vector.shape_cast %43 : vector<32x128xbf16> to vector<2x16x128xbf16>
    %45 = tpu.iota {dimensions = array<i32: 1>} : vector<2x16x16xi32>
    %46 = tpu.iota {dimensions = array<i32: 2>} : vector<2x16x16xi32>
    %c0_17 = arith.constant 0 : index
    %c0_18 = arith.constant 0 : index
    %47 = vector.load %arg2[%c0_17, %c0_18] : memref<2x1xi32, #tpu.memory_space<vmem>>, vector<2x1xi32>
    %48 = vector.shape_cast %47 : vector<2x1xi32> to vector<2x1x1xi32>
    %49 = vector.broadcast %48 : vector<2x1x1xi32> to vector<2x16x16xi32>
    %50 = arith.cmpi slt, %46, %49 : vector<2x16x16xi32>
    %51 = arith.cmpi sle, %46, %45 : vector<2x16x16xi32>
    %52 = arith.andi %50, %51 : vector<2x16x16xi1>
    %c0_19 = arith.constant 0 : index
    %c0_20 = arith.constant 0 : index
    %c0_21 = arith.constant 0 : index
    %53 = vector.load %arg4[%c0_19, %c0_20, %c0_21] : memref<1x128x128xbf16, #tpu.memory_space<vmem>>, vector<1x128x128xbf16>
    %54 = vector.shape_cast %53 : vector<1x128x128xbf16> to vector<128x128xbf16>
    %cst_22 = arith.constant 0.000000e+00 : f32
    %55 = vector.broadcast %cst_22 : f32 to vector<32x128xf32>
    %56 = vector.extract_strided_slice %38 {offsets = [0, 0, 0], sizes = [2, 16, 32], strides = [1, 1, 1]} : vector<2x16x128xbf16> to vector<2x16x32xbf16>
    %57 = vector.extract_strided_slice %41 {offsets = [0, 0, 0], sizes = [2, 16, 32], strides = [1, 1, 1]} : vector<2x16x128xbf16> to vector<2x16x32xbf16>
    %58 = vector.extract_strided_slice %44 {offsets = [0, 0, 0], sizes = [2, 16, 32], strides = [1, 1, 1]} : vector<2x16x128xbf16> to vector<2x16x32xbf16>
    "tpu.trace_start"() <{level = 10 : i32, message = "bqd,bkd->bqk"}> : () -> ()
    %cst_23 = arith.constant dense<0.000000e+00> : vector<2x16x16xf32>
    %59 = tpu.matmul %56, %57, %cst_23 {dimension_numbers = #tpu.dot_dimension_numbers<[2], [2], [1], [1], [0, 0, 0, 1, 1, 1], [0], [0]>} : vector<2x16x32xbf16>, vector<2x16x32xbf16>, vector<2x16x16xf32> -> vector<2x16x16xf32>
    %cst_24 = arith.constant -1.000000e+09 : f32
    "tpu.trace_stop"() : () -> ()
    %60 = vector.broadcast %cst_24 : f32 to vector<2x16x16xf32>
    %61 = arith.select %52, %59, %60 : vector<2x16x16xi1>, vector<2x16x16xf32>
    %cst_25 = arith.constant dense<0xFF800000> : vector<2x16xf32>
    %62 = vector.multi_reduction <maximumf>, %61, %cst_25 [2] : vector<2x16x16xf32> to vector<2x16xf32>
    %63 = vector.shape_cast %62 : vector<2x16xf32> to vector<2x16x1xf32>
    %64 = vector.broadcast %63 : vector<2x16x1xf32> to vector<2x16x16xf32>
    %65 = arith.subf %61, %64 : vector<2x16x16xf32>
    %66 = math.exp %65 : vector<2x16x16xf32>
    %cst_26 = arith.constant dense<0.000000e+00> : vector<2x16xf32>
    %67 = vector.multi_reduction <add>, %66, %cst_26 [2] : vector<2x16x16xf32> to vector<2x16xf32>
    %68 = vector.shape_cast %67 : vector<2x16xf32> to vector<2x16x1xf32>
    %69 = tpu.reciprocal %68 {approx = true} : vector<2x16x1xf32> -> vector<2x16x1xf32>
    %70 = arith.truncf %66 : vector<2x16x16xf32> to vector<2x16x16xbf16>
    "tpu.trace_start"() <{level = 10 : i32, message = "bqk,bkd->bqd"}> : () -> ()
    %cst_27 = arith.constant dense<0.000000e+00> : vector<2x16x32xf32>
    %71 = tpu.matmul %70, %58, %cst_27 {dimension_numbers = #tpu.dot_dimension_numbers<[2], [1], [1], [2], [0, 0, 0, 1, 1, 2], [0], [0]>} : vector<2x16x16xbf16>, vector<2x16x32xbf16>, vector<2x16x32xf32> -> vector<2x16x32xf32>
    "tpu.trace_stop"() : () -> ()
    %72 = vector.broadcast %69 : vector<2x16x1xf32> to vector<2x16x32xf32>
    %73 = arith.mulf %71, %72 : vector<2x16x32xf32>
    %74 = vector.shape_cast %73 : vector<2x16x32xf32> to vector<32x32xf32>
    %75 = arith.truncf %74 : vector<32x32xf32> to vector<32x32xbf16>
    %76 = vector.extract_strided_slice %54 {offsets = [0, 0], sizes = [32, 128], strides = [1, 1]} : vector<128x128xbf16> to vector<32x128xbf16>
    %cst_28 = arith.constant dense<0.000000e+00> : vector<32x128xf32>
    %77 = tpu.matmul %75, %76, %cst_28 {dimension_numbers = #tpu.dot_dimension_numbers<[1], [0], [0], [1], [0, 0, 1, 1], [], []>} : vector<32x32xbf16>, vector<32x128xbf16>, vector<32x128xf32> -> vector<32x128xf32>
    %78 = arith.addf %55, %77 : vector<32x128xf32>
    %79 = vector.extract_strided_slice %38 {offsets = [0, 0, 32], sizes = [2, 16, 32], strides = [1, 1, 1]} : vector<2x16x128xbf16> to vector<2x16x32xbf16>
    %80 = vector.extract_strided_slice %41 {offsets = [0, 0, 32], sizes = [2, 16, 32], strides = [1, 1, 1]} : vector<2x16x128xbf16> to vector<2x16x32xbf16>
    %81 = vector.extract_strided_slice %44 {offsets = [0, 0, 32], sizes = [2, 16, 32], strides = [1, 1, 1]} : vector<2x16x128xbf16> to vector<2x16x32xbf16>
    "tpu.trace_start"() <{level = 10 : i32, message = "bqd,bkd->bqk"}> : () -> ()
    %cst_29 = arith.constant dense<0.000000e+00> : vector<2x16x16xf32>
    %82 = tpu.matmul %79, %80, %cst_29 {dimension_numbers = #tpu.dot_dimension_numbers<[2], [2], [1], [1], [0, 0, 0, 1, 1, 1], [0], [0]>} : vector<2x16x32xbf16>, vector<2x16x32xbf16>, vector<2x16x16xf32> -> vector<2x16x16xf32>
    %cst_30 = arith.constant -1.000000e+09 : f32
    "tpu.trace_stop"() : () -> ()
    %83 = vector.broadcast %cst_30 : f32 to vector<2x16x16xf32>
    %84 = arith.select %52, %82, %83 : vector<2x16x16xi1>, vector<2x16x16xf32>
    %cst_31 = arith.constant dense<0xFF800000> : vector<2x16xf32>
    %85 = vector.multi_reduction <maximumf>, %84, %cst_31 [2] : vector<2x16x16xf32> to vector<2x16xf32>
    %86 = vector.shape_cast %85 : vector<2x16xf32> to vector<2x16x1xf32>
    %87 = vector.broadcast %86 : vector<2x16x1xf32> to vector<2x16x16xf32>
    %88 = arith.subf %84, %87 : vector<2x16x16xf32>
    %89 = math.exp %88 : vector<2x16x16xf32>
    %cst_32 = arith.constant dense<0.000000e+00> : vector<2x16xf32>
    %90 = vector.multi_reduction <add>, %89, %cst_32 [2] : vector<2x16x16xf32> to vector<2x16xf32>
    %91 = vector.shape_cast %90 : vector<2x16xf32> to vector<2x16x1xf32>
    %92 = tpu.reciprocal %91 {approx = true} : vector<2x16x1xf32> -> vector<2x16x1xf32>
    %93 = arith.truncf %89 : vector<2x16x16xf32> to vector<2x16x16xbf16>
    "tpu.trace_start"() <{level = 10 : i32, message = "bqk,bkd->bqd"}> : () -> ()
    %cst_33 = arith.constant dense<0.000000e+00> : vector<2x16x32xf32>
    %94 = tpu.matmul %93, %81, %cst_33 {dimension_numbers = #tpu.dot_dimension_numbers<[2], [1], [1], [2], [0, 0, 0, 1, 1, 2], [0], [0]>} : vector<2x16x16xbf16>, vector<2x16x32xbf16>, vector<2x16x32xf32> -> vector<2x16x32xf32>
    "tpu.trace_stop"() : () -> ()
    %95 = vector.broadcast %92 : vector<2x16x1xf32> to vector<2x16x32xf32>
    %96 = arith.mulf %94, %95 : vector<2x16x32xf32>
    %97 = vector.shape_cast %96 : vector<2x16x32xf32> to vector<32x32xf32>
    %98 = arith.truncf %97 : vector<32x32xf32> to vector<32x32xbf16>
    %99 = vector.extract_strided_slice %54 {offsets = [32, 0], sizes = [32, 128], strides = [1, 1]} : vector<128x128xbf16> to vector<32x128xbf16>
    %cst_34 = arith.constant dense<0.000000e+00> : vector<32x128xf32>
    %100 = tpu.matmul %98, %99, %cst_34 {dimension_numbers = #tpu.dot_dimension_numbers<[1], [0], [0], [1], [0, 0, 1, 1], [], []>} : vector<32x32xbf16>, vector<32x128xbf16>, vector<32x128xf32> -> vector<32x128xf32>
    %101 = arith.addf %78, %100 : vector<32x128xf32>
    %102 = vector.extract_strided_slice %38 {offsets = [0, 0, 64], sizes = [2, 16, 32], strides = [1, 1, 1]} : vector<2x16x128xbf16> to vector<2x16x32xbf16>
    %103 = vector.extract_strided_slice %41 {offsets = [0, 0, 64], sizes = [2, 16, 32], strides = [1, 1, 1]} : vector<2x16x128xbf16> to vector<2x16x32xbf16>
    %104 = vector.extract_strided_slice %44 {offsets = [0, 0, 64], sizes = [2, 16, 32], strides = [1, 1, 1]} : vector<2x16x128xbf16> to vector<2x16x32xbf16>
    "tpu.trace_start"() <{level = 10 : i32, message = "bqd,bkd->bqk"}> : () -> ()
    %cst_35 = arith.constant dense<0.000000e+00> : vector<2x16x16xf32>
    %105 = tpu.matmul %102, %103, %cst_35 {dimension_numbers = #tpu.dot_dimension_numbers<[2], [2], [1], [1], [0, 0, 0, 1, 1, 1], [0], [0]>} : vector<2x16x32xbf16>, vector<2x16x32xbf16>, vector<2x16x16xf32> -> vector<2x16x16xf32>
    %cst_36 = arith.constant -1.000000e+09 : f32
    "tpu.trace_stop"() : () -> ()
    %106 = vector.broadcast %cst_36 : f32 to vector<2x16x16xf32>
    %107 = arith.select %52, %105, %106 : vector<2x16x16xi1>, vector<2x16x16xf32>
    %cst_37 = arith.constant dense<0xFF800000> : vector<2x16xf32>
    %108 = vector.multi_reduction <maximumf>, %107, %cst_37 [2] : vector<2x16x16xf32> to vector<2x16xf32>
    %109 = vector.shape_cast %108 : vector<2x16xf32> to vector<2x16x1xf32>
    %110 = vector.broadcast %109 : vector<2x16x1xf32> to vector<2x16x16xf32>
    %111 = arith.subf %107, %110 : vector<2x16x16xf32>
    %112 = math.exp %111 : vector<2x16x16xf32>
    %cst_38 = arith.constant dense<0.000000e+00> : vector<2x16xf32>
    %113 = vector.multi_reduction <add>, %112, %cst_38 [2] : vector<2x16x16xf32> to vector<2x16xf32>
    %114 = vector.shape_cast %113 : vector<2x16xf32> to vector<2x16x1xf32>
    %115 = tpu.reciprocal %114 {approx = true} : vector<2x16x1xf32> -> vector<2x16x1xf32>
    %116 = arith.truncf %112 : vector<2x16x16xf32> to vector<2x16x16xbf16>
    "tpu.trace_start"() <{level = 10 : i32, message = "bqk,bkd->bqd"}> : () -> ()
    %cst_39 = arith.constant dense<0.000000e+00> : vector<2x16x32xf32>
    %117 = tpu.matmul %116, %104, %cst_39 {dimension_numbers = #tpu.dot_dimension_numbers<[2], [1], [1], [2], [0, 0, 0, 1, 1, 2], [0], [0]>} : vector<2x16x16xbf16>, vector<2x16x32xbf16>, vector<2x16x32xf32> -> vector<2x16x32xf32>
    "tpu.trace_stop"() : () -> ()
    %118 = vector.broadcast %115 : vector<2x16x1xf32> to vector<2x16x32xf32>
    %119 = arith.mulf %117, %118 : vector<2x16x32xf32>
    %120 = vector.shape_cast %119 : vector<2x16x32xf32> to vector<32x32xf32>
    %121 = arith.truncf %120 : vector<32x32xf32> to vector<32x32xbf16>
    %122 = vector.extract_strided_slice %54 {offsets = [64, 0], sizes = [32, 128], strides = [1, 1]} : vector<128x128xbf16> to vector<32x128xbf16>
    %cst_40 = arith.constant dense<0.000000e+00> : vector<32x128xf32>
    %123 = tpu.matmul %121, %122, %cst_40 {dimension_numbers = #tpu.dot_dimension_numbers<[1], [0], [0], [1], [0, 0, 1, 1], [], []>} : vector<32x32xbf16>, vector<32x128xbf16>, vector<32x128xf32> -> vector<32x128xf32>
    %124 = arith.addf %101, %123 : vector<32x128xf32>
    %125 = vector.extract_strided_slice %38 {offsets = [0, 0, 96], sizes = [2, 16, 32], strides = [1, 1, 1]} : vector<2x16x128xbf16> to vector<2x16x32xbf16>
    %126 = vector.extract_strided_slice %41 {offsets = [0, 0, 96], sizes = [2, 16, 32], strides = [1, 1, 1]} : vector<2x16x128xbf16> to vector<2x16x32xbf16>
    %127 = vector.extract_strided_slice %44 {offsets = [0, 0, 96], sizes = [2, 16, 32], strides = [1, 1, 1]} : vector<2x16x128xbf16> to vector<2x16x32xbf16>
    "tpu.trace_start"() <{level = 10 : i32, message = "bqd,bkd->bqk"}> : () -> ()
    %cst_41 = arith.constant dense<0.000000e+00> : vector<2x16x16xf32>
    %128 = tpu.matmul %125, %126, %cst_41 {dimension_numbers = #tpu.dot_dimension_numbers<[2], [2], [1], [1], [0, 0, 0, 1, 1, 1], [0], [0]>} : vector<2x16x32xbf16>, vector<2x16x32xbf16>, vector<2x16x16xf32> -> vector<2x16x16xf32>
    %cst_42 = arith.constant -1.000000e+09 : f32
    "tpu.trace_stop"() : () -> ()
    %129 = vector.broadcast %cst_42 : f32 to vector<2x16x16xf32>
    %130 = arith.select %52, %128, %129 : vector<2x16x16xi1>, vector<2x16x16xf32>
    %cst_43 = arith.constant dense<0xFF800000> : vector<2x16xf32>
    %131 = vector.multi_reduction <maximumf>, %130, %cst_43 [2] : vector<2x16x16xf32> to vector<2x16xf32>
    %132 = vector.shape_cast %131 : vector<2x16xf32> to vector<2x16x1xf32>
    %133 = vector.broadcast %132 : vector<2x16x1xf32> to vector<2x16x16xf32>
    %134 = arith.subf %130, %133 : vector<2x16x16xf32>
    %135 = math.exp %134 : vector<2x16x16xf32>
    %cst_44 = arith.constant dense<0.000000e+00> : vector<2x16xf32>
    %136 = vector.multi_reduction <add>, %135, %cst_44 [2] : vector<2x16x16xf32> to vector<2x16xf32>
    %137 = vector.shape_cast %136 : vector<2x16xf32> to vector<2x16x1xf32>
    %138 = tpu.reciprocal %137 {approx = true} : vector<2x16x1xf32> -> vector<2x16x1xf32>
    %139 = arith.truncf %135 : vector<2x16x16xf32> to vector<2x16x16xbf16>
    "tpu.trace_start"() <{level = 10 : i32, message = "bqk,bkd->bqd"}> : () -> ()
    %cst_45 = arith.constant dense<0.000000e+00> : vector<2x16x32xf32>
    %140 = tpu.matmul %139, %127, %cst_45 {dimension_numbers = #tpu.dot_dimension_numbers<[2], [1], [1], [2], [0, 0, 0, 1, 1, 2], [0], [0]>} : vector<2x16x16xbf16>, vector<2x16x32xbf16>, vector<2x16x32xf32> -> vector<2x16x32xf32>
    "tpu.trace_stop"() : () -> ()
    %141 = vector.broadcast %138 : vector<2x16x1xf32> to vector<2x16x32xf32>
    %142 = arith.mulf %140, %141 : vector<2x16x32xf32>
    %143 = vector.shape_cast %142 : vector<2x16x32xf32> to vector<32x32xf32>
    %144 = arith.truncf %143 : vector<32x32xf32> to vector<32x32xbf16>
    %145 = vector.extract_strided_slice %54 {offsets = [96, 0], sizes = [32, 128], strides = [1, 1]} : vector<128x128xbf16> to vector<32x128xbf16>
    %cst_46 = arith.constant dense<0.000000e+00> : vector<32x128xf32>
    %146 = tpu.matmul %144, %145, %cst_46 {dimension_numbers = #tpu.dot_dimension_numbers<[1], [0], [0], [1], [0, 0, 1, 1], [], []>} : vector<32x32xbf16>, vector<32x128xbf16>, vector<32x128xf32> -> vector<32x128xf32>
    %147 = arith.addf %124, %146 : vector<32x128xf32>
    %148 = arith.addf %3, %147 : vector<32x128xf32>
    %c0_47 = arith.constant 0 : index
    %c0_48 = arith.constant 0 : index
    %c0_49 = arith.constant 0 : index
    %149 = vector.load %arg5[%c0_47, %c0_48, %c0_49] : memref<1x1x128xf32, #tpu.memory_space<vmem>>, vector<1x1x128xf32>
    %150 = vector.shape_cast %149 : vector<1x1x128xf32> to vector<1x128xf32>
    %151 = vector.broadcast %150 : vector<1x128xf32> to vector<32x128xf32>
    %152 = arith.addf %148, %151 : vector<32x128xf32>
    %cst_50 = arith.constant dense<0.000000e+00> : vector<32xf32>
    %153 = vector.multi_reduction <add>, %152, %cst_50 [1] : vector<32x128xf32> to vector<32xf32>
    %154 = vector.shape_cast %153 : vector<32xf32> to vector<32x1xf32>
    %cst_51 = arith.constant 1.280000e+02 : f32
    %155 = vector.broadcast %cst_51 : f32 to vector<32x1xf32>
    %156 = arith.divf %154, %155 : vector<32x1xf32>
    %157 = vector.broadcast %156 : vector<32x1xf32> to vector<32x128xf32>
    %158 = arith.subf %152, %157 : vector<32x128xf32>
    %159 = arith.mulf %158, %158 : vector<32x128xf32>
    %cst_52 = arith.constant dense<0.000000e+00> : vector<32xf32>
    %160 = vector.multi_reduction <add>, %159, %cst_52 [1] : vector<32x128xf32> to vector<32xf32>
    %161 = vector.shape_cast %160 : vector<32xf32> to vector<32x1xf32>
    %cst_53 = arith.constant 1.280000e+02 : f32
    %162 = vector.broadcast %cst_53 : f32 to vector<32x1xf32>
    %163 = arith.divf %161, %162 : vector<32x1xf32>
    %164 = vector.broadcast %156 : vector<32x1xf32> to vector<32x128xf32>
    %165 = arith.subf %152, %164 : vector<32x128xf32>
    %cst_54 = arith.constant 9.99999974E-6 : f32
    %166 = vector.broadcast %cst_54 : f32 to vector<32x1xf32>
    %167 = arith.addf %163, %166 : vector<32x1xf32>
    %168 = math.rsqrt %167 : vector<32x1xf32>
    %169 = vector.broadcast %168 : vector<32x1xf32> to vector<32x128xf32>
    %170 = arith.mulf %165, %169 : vector<32x128xf32>
    %c0_55 = arith.constant 0 : index
    %c0_56 = arith.constant 0 : index
    %c0_57 = arith.constant 0 : index
    %171 = vector.load %arg12[%c0_55, %c0_56, %c0_57] : memref<1x1x128xf32, #tpu.memory_space<vmem>>, vector<1x1x128xf32>
    %172 = vector.shape_cast %171 : vector<1x1x128xf32> to vector<1x128xf32>
    %173 = vector.broadcast %172 : vector<1x128xf32> to vector<32x128xf32>
    %174 = arith.mulf %170, %173 : vector<32x128xf32>
    %c0_58 = arith.constant 0 : index
    %c0_59 = arith.constant 0 : index
    %c0_60 = arith.constant 0 : index
    %175 = vector.load %arg13[%c0_58, %c0_59, %c0_60] : memref<1x1x128xf32, #tpu.memory_space<vmem>>, vector<1x1x128xf32>
    %176 = vector.shape_cast %175 : vector<1x1x128xf32> to vector<1x128xf32>
    %177 = vector.broadcast %176 : vector<1x128xf32> to vector<32x128xf32>
    %178 = arith.addf %174, %177 : vector<32x128xf32>
    %179 = arith.truncf %178 : vector<32x128xf32> to vector<32x128xbf16>
    %c0_61 = arith.constant 0 : index
    %c0_62 = arith.constant 0 : index
    %c0_63 = arith.constant 0 : index
    %180 = vector.load %arg6[%c0_61, %c0_62, %c0_63] : memref<1x128x256xbf16, #tpu.memory_space<vmem>>, vector<1x128x256xbf16>
    %181 = vector.shape_cast %180 : vector<1x128x256xbf16> to vector<128x256xbf16>
    %cst_64 = arith.constant dense<0.000000e+00> : vector<32x256xf32>
    %182 = tpu.matmul %179, %181, %cst_64 {dimension_numbers = #tpu.dot_dimension_numbers<[1], [0], [0], [1], [0, 0, 1, 1], [], []>} : vector<32x128xbf16>, vector<128x256xbf16>, vector<32x256xf32> -> vector<32x256xf32>
    %c0_65 = arith.constant 0 : index
    %c0_66 = arith.constant 0 : index
    %c0_67 = arith.constant 0 : index
    %183 = vector.load %arg7[%c0_65, %c0_66, %c0_67] : memref<1x1x256xf32, #tpu.memory_space<vmem>>, vector<1x1x256xf32>
    %184 = vector.shape_cast %183 : vector<1x1x256xf32> to vector<1x256xf32>
    %185 = vector.broadcast %184 : vector<1x256xf32> to vector<32x256xf32>
    %186 = arith.addf %182, %185 : vector<32x256xf32>
    %187 = arith.mulf %186, %186 : vector<32x256xf32>
    %188 = arith.mulf %186, %187 : vector<32x256xf32>
    %cst_68 = arith.constant 4.471500e-02 : f32
    %189 = vector.broadcast %cst_68 : f32 to vector<32x256xf32>
    %190 = arith.mulf %189, %188 : vector<32x256xf32>
    %191 = arith.addf %186, %190 : vector<32x256xf32>
    %cst_69 = arith.constant 0.797884583 : f32
    %192 = vector.broadcast %cst_69 : f32 to vector<32x256xf32>
    %193 = arith.mulf %192, %191 : vector<32x256xf32>
    %194 = math.tanh %193 : vector<32x256xf32>
    %cst_70 = arith.constant 1.000000e+00 : f32
    %195 = vector.broadcast %cst_70 : f32 to vector<32x256xf32>
    %196 = arith.addf %195, %194 : vector<32x256xf32>
    %cst_71 = arith.constant 5.000000e-01 : f32
    %197 = vector.broadcast %cst_71 : f32 to vector<32x256xf32>
    %198 = arith.mulf %197, %196 : vector<32x256xf32>
    %199 = arith.mulf %186, %198 : vector<32x256xf32>
    %200 = arith.truncf %199 : vector<32x256xf32> to vector<32x256xbf16>
    %c0_72 = arith.constant 0 : index
    %c0_73 = arith.constant 0 : index
    %c0_74 = arith.constant 0 : index
    %201 = vector.load %arg8[%c0_72, %c0_73, %c0_74] : memref<1x256x128xbf16, #tpu.memory_space<vmem>>, vector<1x256x128xbf16>
    %202 = vector.shape_cast %201 : vector<1x256x128xbf16> to vector<256x128xbf16>
    %cst_75 = arith.constant dense<0.000000e+00> : vector<32x128xf32>
    %203 = tpu.matmul %200, %202, %cst_75 {dimension_numbers = #tpu.dot_dimension_numbers<[1], [0], [0], [1], [0, 0, 1, 1], [], []>} : vector<32x256xbf16>, vector<256x128xbf16>, vector<32x128xf32> -> vector<32x128xf32>
    %204 = arith.addf %152, %203 : vector<32x128xf32>
    %c0_76 = arith.constant 0 : index
    %c0_77 = arith.constant 0 : index
    %c0_78 = arith.constant 0 : index
    %205 = vector.load %arg9[%c0_76, %c0_77, %c0_78] : memref<1x1x128xf32, #tpu.memory_space<vmem>>, vector<1x1x128xf32>
    %206 = vector.shape_cast %205 : vector<1x1x128xf32> to vector<1x128xf32>
    %207 = vector.broadcast %206 : vector<1x128xf32> to vector<32x128xf32>
    %208 = arith.addf %204, %207 : vector<32x128xf32>
    %c0_79 = arith.constant 0 : index
    %c0_80 = arith.constant 0 : index
    %209 = vector.load %arg18[%c0_79, %c0_80] : memref<32x128xf32, #tpu.memory_space<vmem>>, vector<32x128xf32>
    tpu.vector_store %arg18[%c0_79, %c0_80], %208 {strides = array<i32>} : memref<32x128xf32, #tpu.memory_space<vmem>>, vector<32x128xf32>,
    %c1_i32 = arith.constant 1 : i32
    %210 = arith.cmpi eq, %arg0, %c1_i32 : i32
    %211 = arith.extui %210 : i1 to i32
    %c0_i32_81 = arith.constant 0 : i32
    %212 = arith.cmpi ne, %211, %c0_i32_81 : i32
    scf.if %212 {
      %cst_82 = arith.constant dense<0.000000e+00> : vector<32xf32>
      %213 = vector.multi_reduction <add>, %208, %cst_82 [1] : vector<32x128xf32> to vector<32xf32>
      %214 = vector.shape_cast %213 : vector<32xf32> to vector<32x1xf32>
      %cst_83 = arith.constant 1.280000e+02 : f32
      %215 = vector.broadcast %cst_83 : f32 to vector<32x1xf32>
      %216 = arith.divf %214, %215 : vector<32x1xf32>
      %217 = vector.broadcast %216 : vector<32x1xf32> to vector<32x128xf32>
      %218 = arith.subf %208, %217 : vector<32x128xf32>
      %219 = arith.mulf %218, %218 : vector<32x128xf32>
      %cst_84 = arith.constant dense<0.000000e+00> : vector<32xf32>
      %220 = vector.multi_reduction <add>, %219, %cst_84 [1] : vector<32x128xf32> to vector<32xf32>
      %221 = vector.shape_cast %220 : vector<32xf32> to vector<32x1xf32>
      %cst_85 = arith.constant 1.280000e+02 : f32
      %222 = vector.broadcast %cst_85 : f32 to vector<32x1xf32>
      %223 = arith.divf %221, %222 : vector<32x1xf32>
      %224 = vector.broadcast %216 : vector<32x1xf32> to vector<32x128xf32>
      %225 = arith.subf %208, %224 : vector<32x128xf32>
      %cst_86 = arith.constant 9.99999974E-6 : f32
      %226 = vector.broadcast %cst_86 : f32 to vector<32x1xf32>
      %227 = arith.addf %223, %226 : vector<32x1xf32>
      %228 = math.rsqrt %227 : vector<32x1xf32>
      %229 = vector.broadcast %228 : vector<32x1xf32> to vector<32x128xf32>
      %230 = arith.mulf %225, %229 : vector<32x128xf32>
      %c0_87 = arith.constant 0 : index
      %c0_88 = arith.constant 0 : index
      %231 = vector.load %arg15[%c0_87, %c0_88] : memref<1x128xf32, #tpu.memory_space<vmem>>, vector<1x128xf32>
      %232 = vector.broadcast %231 : vector<1x128xf32> to vector<32x128xf32>
      %233 = arith.mulf %230, %232 : vector<32x128xf32>
      %c0_89 = arith.constant 0 : index
      %c0_90 = arith.constant 0 : index
      %234 = vector.load %arg16[%c0_89, %c0_90] : memref<1x128xf32, #tpu.memory_space<vmem>>, vector<1x128xf32>
      %235 = vector.broadcast %234 : vector<1x128xf32> to vector<32x128xf32>
      %236 = arith.addf %233, %235 : vector<32x128xf32>
      %237 = arith.truncf %236 : vector<32x128xf32> to vector<32x128xbf16>
      %c0_91 = arith.constant 0 : index
      %c0_92 = arith.constant 0 : index
      %238 = vector.load %arg14[%c0_91, %c0_92] : memref<128x256xbf16, #tpu.memory_space<vmem>>, vector<128x256xbf16>
      %cst_93 = arith.constant dense<0.000000e+00> : vector<32x256xf32>
      %239 = tpu.matmul %237, %238, %cst_93 {dimension_numbers = #tpu.dot_dimension_numbers<[1], [0], [0], [1], [0, 0, 1, 1], [], []>} : vector<32x128xbf16>, vector<128x256xbf16>, vector<32x256xf32> -> vector<32x256xf32>
      %240 = vector.shape_cast %239 : vector<32x256xf32> to vector<2x16x256xf32>
      %c0_94 = arith.constant 0 : index
      %c0_95 = arith.constant 0 : index
      %c0_96 = arith.constant 0 : index
      %241 = vector.load %arg17[%c0_94, %c0_95, %c0_96] : memref<2x16x256xf32, #tpu.memory_space<vmem>>, vector<2x16x256xf32>
      tpu.vector_store %arg17[%c0_94, %c0_95, %c0_96], %240 {strides = array<i32>} : memref<2x16x256xf32, #tpu.memory_space<vmem>>, vector<2x16x256xf32>,
    } else {
    }
    return
  }
  func.func @transform_0(%arg0: i32) -> (i32, i32, i32) {
    %c0_i32 = arith.constant 0 : i32
    %c0_i32_0 = arith.constant 0 : i32
    %c0_i32_1 = arith.constant 0 : i32
    %c0_i32_2 = arith.constant 0 : i32
    return %c0_i32, %c0_i32_0, %c0_i32_1 : i32, i32, i32
  }
  func.func @transform_1(%arg0: i32) -> (i32, i32) {
    %c0_i32 = arith.constant 0 : i32
    %c0_i32_0 = arith.constant 0 : i32
    %c0_i32_1 = arith.constant 0 : i32
    return %c0_i32, %c0_i32_0 : i32, i32
  }
  func.func @transform_2(%arg0: i32) -> (i32, i32, i32) {
    %c0_i32 = arith.constant 0 : i32
    %c0_i32_0 = arith.constant 0 : i32
    %c0_i32_1 = arith.constant 0 : i32
    return %arg0, %c0_i32, %c0_i32_0 : i32, i32, i32
  }
  func.func @transform_3(%arg0: i32) -> (i32, i32, i32) {
    %c0_i32 = arith.constant 0 : i32
    %c0_i32_0 = arith.constant 0 : i32
    %c0_i32_1 = arith.constant 0 : i32
    return %arg0, %c0_i32, %c0_i32_0 : i32, i32, i32
  }
  func.func @transform_4(%arg0: i32) -> (i32, i32, i32) {
    %c0_i32 = arith.constant 0 : i32
    %c0_i32_0 = arith.constant 0 : i32
    %c0_i32_1 = arith.constant 0 : i32
    return %arg0, %c0_i32, %c0_i32_0 : i32, i32, i32
  }
  func.func @transform_5(%arg0: i32) -> (i32, i32, i32) {
    %c0_i32 = arith.constant 0 : i32
    %c0_i32_0 = arith.constant 0 : i32
    %c0_i32_1 = arith.constant 0 : i32
    return %arg0, %c0_i32, %c0_i32_0 : i32, i32, i32
  }
  func.func @transform_6(%arg0: i32) -> (i32, i32, i32) {
    %c0_i32 = arith.constant 0 : i32
    %c0_i32_0 = arith.constant 0 : i32
    %c0_i32_1 = arith.constant 0 : i32
    return %arg0, %c0_i32, %c0_i32_0 : i32, i32, i32
  }
  func.func @transform_7(%arg0: i32) -> (i32, i32, i32) {
    %c0_i32 = arith.constant 0 : i32
    %c0_i32_0 = arith.constant 0 : i32
    %c0_i32_1 = arith.constant 0 : i32
    return %arg0, %c0_i32, %c0_i32_0 : i32, i32, i32
  }
  func.func @transform_8(%arg0: i32) -> (i32, i32, i32) {
    %c0_i32 = arith.constant 0 : i32
    %c0_i32_0 = arith.constant 0 : i32
    %c0_i32_1 = arith.constant 0 : i32
    return %arg0, %c0_i32, %c0_i32_0 : i32, i32, i32
  }
  func.func @transform_9(%arg0: i32) -> (i32, i32, i32) {
    %c0_i32 = arith.constant 0 : i32
    %c0_i32_0 = arith.constant 0 : i32
    %c0_i32_1 = arith.constant 0 : i32
    return %arg0, %c0_i32, %c0_i32_0 : i32, i32, i32
  }
  func.func @transform_10(%arg0: i32) -> (i32, i32, i32) {
    %c0_i32 = arith.constant 0 : i32
    %c0_i32_0 = arith.constant 0 : i32
    %c0_i32_1 = arith.constant 0 : i32
    return %arg0, %c0_i32, %c0_i32_0 : i32, i32, i32
  }
  func.func @transform_11(%arg0: i32) -> (i32, i32, i32) {
    %c0_i32 = arith.constant 0 : i32
    %c0_i32_0 = arith.constant 0 : i32
    %c0_i32_1 = arith.constant 0 : i32
    return %arg0, %c0_i32, %c0_i32_0 : i32, i32, i32
  }
  func.func @transform_12(%arg0: i32) -> (i32, i32, i32) {
    %c0_i32 = arith.constant 0 : i32
    %c0_i32_0 = arith.constant 0 : i32
    %c0_i32_1 = arith.constant 0 : i32
    return %arg0, %c0_i32, %c0_i32_0 : i32, i32, i32
  }
  func.func @transform_13(%arg0: i32) -> (i32, i32) {
    %c0_i32 = arith.constant 0 : i32
    %c0_i32_0 = arith.constant 0 : i32
    %c0_i32_1 = arith.constant 0 : i32
    return %c0_i32, %c0_i32_0 : i32, i32
  }
  func.func @transform_14(%arg0: i32) -> (i32, i32) {
    %c0_i32 = arith.constant 0 : i32
    %c0_i32_0 = arith.constant 0 : i32
    %c0_i32_1 = arith.constant 0 : i32
    return %c0_i32, %c0_i32_0 : i32, i32
  }
  func.func @transform_15(%arg0: i32) -> (i32, i32) {
    %c0_i32 = arith.constant 0 : i32
    %c0_i32_0 = arith.constant 0 : i32
    %c0_i32_1 = arith.constant 0 : i32
    return %c0_i32, %c0_i32_0 : i32, i32
  }
  func.func @transform_16(%arg0: i32) -> (i32, i32, i32) {
    %c0_i32 = arith.constant 0 : i32
    %c0_i32_0 = arith.constant 0 : i32
    %c0_i32_1 = arith.constant 0 : i32
    %c0_i32_2 = arith.constant 0 : i32
    return %c0_i32, %c0_i32_0, %c0_i32_1 : i32, i32, i32
  }
}

</mosaic_0001>

<bundles_post_ra>
// kernel: tiny_story_forward.1
= control target key start
LH: loop header
LB: loop body
LE: loop exit
PB: predicated region body
PF: predicated region fallthrough
CT: control target
= control target key end

     0   :  { %s5105_s0 = inlined_call_operand.vmem [shape: f32[2,16,128], index: 0, kind: input, shape index: {}]   ;;  %s5106_s1 = inlined_call_operand.vmem [shape: s32[2,1], index: 1, kind: input, shape index: {}]   ;;  %s5107_s2 = inlined_call_operand.vmem [shape: bf16[2,128,384], index: 2, kind: input, shape index: {}]   ;;  %s5108_s3 = inlined_call_operand.hbm [shape: bf16[2,128,128], index: 3, kind: input, shape index: {}]   ;;  %s5109_s4 = inlined_call_operand.vmem [shape: f32[2,1,128], index: 4, kind: input, shape index: {}]   ;;  %s5110_s5 = inlined_call_operand.hbm [shape: bf16[2,128,256], index: 5, kind: input, shape index: {}]   ;;  %s5111_s6 = inlined_call_operand.vmem [shape: f32[2,1,256], index: 6, kind: input, shape index: {}]   ;;  %s5112_s7 = inlined_call_operand.hbm [shape: bf16[2,256,128], index: 7, kind: input, shape index: {}]   ;;  %s5113_s8 = inlined_call_operand.vmem [shape: f32[2,1,128], index: 8, kind: input, shape index: {}]   ;;  %s5114_s9 = inlined_call_operand.vmem [shape: f32[2,1,128], index: 9, kind: input, shape index: {}]   ;;  %s5115_s10 = inlined_call_operand.vmem [shape: f32[2,1,128], index: 10, kind: input, shape index: {}]   ;;  %s5116_s11 = inlined_call_operand.vmem [shape: f32[2,1,128], index: 11, kind: input, shape index: {}]   ;;  %s5117_s12 = inlined_call_operand.vmem [shape: f32[2,1,128], index: 12, kind: input, shape index: {}]   ;;  %s5118_s13 = inlined_call_operand.vmem [shape: bf16[128,256], index: 13, kind: input, shape index: {}]   ;;  %s5119_s14 = inlined_call_operand.vmem [shape: f32[1,128], index: 14, kind: input, shape index: {}]   ;;  %s5120_s15 = inlined_call_operand.vmem [shape: f32[1,128], index: 15, kind: input, shape index: {}]   ;;  %s5121_s16 = inlined_call_operand.hbm [shape: f32[2,16,256], index: 16, kind: output, shape index: {}]  }
   0x1   :  { %5131 = sst [smem:[#allocation16_spill]] %s5105_s0 }
   0x2   :  { %5132 = sst [smem:[#allocation17_spill]] %s5106_s1 }
   0x3   :  { %5133 = sst [smem:[#allocation18_spill]] %s5107_s2 }
   0x4   :  { %5134 = sst [smem:[#allocation19_spill]] %s5108_s3 }
   0x5   :  { %5135 = sst [smem:[#allocation20_spill]] %s5110_s5 }
   0x6   :  { %5136 = sst [smem:[#allocation21_spill]] %s5112_s7 }
   0x7   :  { %5137 = sst [smem:[#allocation22_spill]] %s5118_s13 }
   0x8   :  { %5138 = sst [smem:[#allocation23_spill]] %s5119_s14 }
   0x9   :  { %5139 = sst [smem:[#allocation24_spill]] %s5120_s15 }
   0xa   :  { %5140 = sst [smem:[#allocation25_spill]] %s5121_s16 }
   0xb   :  { %21 = vsyncpa [#allocation4], 0 }
   0xc   :  { %23 = vsyncpa [#allocation4 + $0x1], 0 }
   0xd   :  { %24 = vsyncpa [#allocation7], 0 }
   0xe   :  { %26 = vsyncpa [#allocation7 + $0x1], 0 }
   0xf   :  { %27 = vsyncpa [#allocation5], 0  ;;  %s4287_s21 = smov 0   ;;  %s4289_s22 = smov 0  }
  0x10   :  { %s4291_s23 = smov 0   ;;  %s4293_s24 = smov 0  }
  0x11 LB: > { %5141 = sst [smem:[#allocation13_spill]] %s4178_s23  ;;  %s4306_s25 = sadd.s32 4294967295, %s4182_s24   ;;  %s4182_s24 = sphi %s4293_s24, %s5173_s24   ;;  %s4178_s23 = sphi %s4291_s23, %s5175_s23   ;;  %s4174_s22 = sphi %s4289_s22, %s5177_s22   ;;  %s4170_s21 = sphi %s4287_s21, %s5176_s21  }
  0x12   : > { %s4309_s26 = sadd.s32 1, %s4182_s24   ;;  %s108_s28 = sadd.s32 1, %s4178_s23 }
  0x13   : > { %5142 = sst [smem:[#allocation14_spill]] %s4309_s26  ;;  %s105_s27 = ssub.s32 %s4182_s24, %s4309_s26 }
  0x14   : > { %p106_p0 = scmp.eq.s32.totalorder %s105_s27, 0  ;;  %p115_p1 = scmp.ne.s32.totalorder %s4178_s23, %s4174_s22 }
  0x15   : > { %p116_p2 = scmp.eq.s32.totalorder %s4182_s24, 0  ;;  %p121_p3 = scmp.ne.s32.totalorder %s4174_s22, %s4170_s21 }
  0x16   : > { %s4319_s29 = scalar_select %p106_p0, %s4178_s23, %s108_s28  }
  0x17   : > { %p117_p4 = por %p116_p2, %p115_p1  ;;  %p122_p5 = scmp.eq.s32.totalorder %s4306_s25, 0 }
  0x18   : > { %5143 = sst [smem:[#allocation15_spill]] %s4319_s29  ;;  %p3760_p6 = scmp.lt.s32.totalorder %s4182_s24, 2 }
  0x19   : > { %p4323_p7 = por %p122_p5, %p121_p3  ;;  %s4328_s0 = sand.u32 1, %s4178_s23  }
  0x1a   : > { %p4330_p8 = pnand %p3760_p6, %p117_p4  ;;  %s513_s18 = sand.u32 1, %s4182_s24  }
  0x1b   : > { %s5144_s30 = scalar_select %p4323_p7, 1, 0 }
  0x1c   : > { %s5127_s19 = sshll.u32 %s4328_s0, 7  ;;  %s5128_s20 = sshll.u32 %s4182_s24, 11 }
  0x1d   : > { %s517_s21 = scalar_lea.vmem [#allocation6], %s5127_s19  ;;  %s5146_s5 = sld [smem:[#allocation20_spill]] }
  0x1e   : > { %s524_s27 = sshll.u32 %s517_s21, 4  ;;  %s4348_s23 = scalar_lea.sflag [#allocation7], %s513_s18  ;;  %s4346_s27 = int_to_ptr.vmem [resolvable:$true] %s524_s27 }
  0x1f   : > { %p4354_p10 = pneg %p4330_p8 }
  0x23   : > { %s4344_s26 = scalar_lea.hbm %s5146_s5, %s5128_s20  ;;  %s4029_s28 = scalar_lea.hbm %s5146_s5, 4096 }
  0x24   : > { %s4024_s16 = scalar_lea.hbm %s4344_s26, 2048  ;;  %p4030_p13 = scmp.lt.u32.totalorder %s4344_s26, %s5146_s5 }
  0x25   : > { %p4025_p9 = scmp.ne.s32.totalorder %s4344_s26, %s4024_s16  ;;  %p4031_p0 = scmp.lt.u32.totalorder %s4029_s28, %s4024_s16 }
  0x26   : > { %p4033_p2 = scmp.lt.u32.totalorder %s4024_s16, %s4344_s26 }
  0x27   : > { %p4027_p11 = pnand %p4354_p10, %p4025_p9  ;;  %p4032_p1 = por %p4031_p0, %p4030_p13 }
  0x29   : > { %p4028_p12 = pneg %p4027_p11  ;;  %p4034_p3 = por %p4033_p2, %p4032_p1 }
  0x2b   : > { %p4035_p4 = pnand %p4034_p3, %p4028_p12 }
  0x2d   : > { %4038 = shalt.err (!%p4035_p4)
}
  0x2e   : > { %s4039_s18 = scalar_lea.vmem %s4346_s27, 2048  ;;  %s4184_s29 = smov [#allocation6]  }
  0x2f   : > { %p4040_p5 = scmp.ne.s32.totalorder %s4346_s27, %s4039_s18  ;;  %s4044_s21 = sshll.u32 %s4184_s29, 4  ;;  %s4045_s21 = int_to_ptr.vmem [resolvable:$false] %s4044_s21 }
  0x30   : > { %s4046_s15 = scalar_lea.vmem %s4045_s21, 4096  ;;  %p4047_p11 = scmp.lt.s32.totalorder %s4346_s27, %s4045_s21 }
  0x31   : > { %p4042_p6 = pnand %p4040_p5, %p4354_p10  ;;  %p4048_p7 = scmp.lt.s32.totalorder %s4046_s15, %s4039_s18 }
  0x33   : > { %p4043_p9 = pneg %p4042_p6  ;;  %p4049_p13 = por %p4048_p7, %p4047_p11 }
  0x35   : > { %p4050_p0 = pnand %p4049_p13, %p4043_p9 }
  0x37   : > { %4053 = shalt.err (!%p4050_p0)
}
  0x38   : > { %s4185_s16 = smov 128   ;;  %s4186_s20 = smov 8  }
  0x39   : > { %3756 = dma.hbm_to_vmem [thread:$0]  (!%p4330_p8), %s4344_s26, 2048, %s4346_s27, %s4348_s23, %s4185_s16, %s4185_s16, %s4186_s20  }
  0x3a   : > { %s5148_s28 = sshll.u32 %s4182_s24, 11  ;;  %s5149_s7 = sld [smem:[#allocation21_spill]] }
  0x3b   : > { %s5150_s15 = sshll.u32 %s4328_s0, 7  ;;  %p3349_p7 = scmp.ge.s32.totalorder %s4182_s24, 1 }
  0x3c   : > { %s545_s5 = scalar_lea.vmem [#allocation8], %s5150_s15  ;;  %p590_p12 = scmp.lt.s32.totalorder %s4182_s24, 3 }
  0x3d   : > { %s552_s14 = sshll.u32 %s545_s5, 4  ;;  %s3340_s13 = sshll.u32 %s4328_s0, 6  ;;  %s4388_s14 = int_to_ptr.vmem [resolvable:$true] %s552_s14 }
  0x3e   : > { %p4392_p1 = pnand %p3349_p7, %p590_p12  ;;  %s3474_s26 = sshll.u32 %s4182_s24, 10 }
  0x3f   : > { %s490_s27 = scalar_lea.vmem [#allocation3], %s3340_s13  ;;  %s5152_s3 = sld [smem:[#allocation19_spill]] }
  0x40   : > { %s4383_s21 = scalar_lea.hbm %s5149_s7, %s5148_s28  ;;  %s497_s16 = sshll.u32 %s490_s27, 4  ;;  %s4402_s16 = int_to_ptr.vmem [resolvable:$true] %s497_s16 }
  0x41   : > { %s5151_s1 = scalar_select %p4392_p1, 1, 0 }
  0x42   : > { %s487_s5 = scalar_lea.sflag [#allocation4], %s4328_s0 }
  0x45   : > { %s4400_s28 = scalar_lea.hbm %s5152_s3, %s3474_s26  ;;  %s4059_s15 = scalar_lea.hbm %s5152_s3, 2048 }
  0x46   : > { %s4054_s29 = scalar_lea.hbm %s4400_s28, 1024  ;;  %p4060_p5 = scmp.lt.u32.totalorder %s4400_s28, %s5152_s3 }
  0x47   : > { %p4055_p2 = scmp.ne.s32.totalorder %s4400_s28, %s4054_s29  ;;  %p4061_p6 = scmp.lt.u32.totalorder %s4059_s15, %s4054_s29 }
  0x48   : > { %p4063_p11 = scmp.lt.u32.totalorder %s4054_s29, %s4400_s28 }
  0x49   : > { %p4057_p3 = pnand %p4055_p2, %p4354_p10  ;;  %p4062_p9 = por %p4061_p6, %p4060_p5 }
  0x4b   : > { %p4058_p4 = pneg %p4057_p3  ;;  %p4064_p13 = por %p4063_p11, %p4062_p9 }
  0x4d   : > { %p4065_p0 = pnand %p4064_p13, %p4058_p4 }
  0x4f   : > { %4068 = shalt.err (!%p4065_p0)
}
  0x50   : > { %s4069_s26 = scalar_lea.vmem %s4402_s16, 1024  ;;  %s4187_s18 = smov [#allocation3]  }
  0x51   : > { %p4070_p7 = scmp.ne.s32.totalorder %s4402_s16, %s4069_s26  ;;  %s4074_s24 = sshll.u32 %s4187_s18, 4  ;;  %s4075_s24 = int_to_ptr.vmem [resolvable:$false] %s4074_s24 }
  0x52   : > { %s4076_s13 = scalar_lea.vmem %s4075_s24, 2048  ;;  %p4077_p3 = scmp.lt.s32.totalorder %s4402_s16, %s4075_s24 }
  0x53   : > { %p4072_p12 = pnand %p4070_p7, %p4354_p10  ;;  %p4078_p1 = scmp.lt.s32.totalorder %s4076_s13, %s4069_s26 }
  0x55   : > { %p4073_p2 = pneg %p4072_p12  ;;  %p4079_p5 = por %p4078_p1, %p4077_p3 }
  0x57   : > { %p4080_p6 = pnand %p4079_p5, %p4073_p2 }
  0x59   : > { %4083 = shalt.err (!%p4080_p6)
}
  0x5a   : > { %s4188_s29 = smov 64   ;;  %s4189_s15 = smov 4  }
  0x5b   : > { %3753 = dma.hbm_to_vmem [thread:$0]  (!%p4330_p8), %s4400_s28, 1024, %s4402_s16, %s487_s5, %s4188_s29, %s4188_s29, %s4189_s15  }
  0x5c   : > { %s4084_s27 = scalar_lea.hbm %s4383_s21, 2048  ;;  %s4089_s18 = scalar_lea.hbm %s5149_s7, 4096 }
  0x5d   : > { %p4085_p1 = scmp.ne.s32.totalorder %s4383_s21, %s4084_s27  ;;  %p4090_p11 = scmp.lt.u32.totalorder %s4383_s21, %s5149_s7 }
  0x5e   : > { %p4091_p13 = scmp.lt.u32.totalorder %s4089_s18, %s4084_s27  ;;  %p4093_p7 = scmp.lt.u32.totalorder %s4084_s27, %s4383_s21 }
  0x5f   : > { %p4087_p4 = pnand %p4085_p1, %p4354_p10 }
  0x60   : > { %p4092_p0 = por %p4091_p13, %p4090_p11 }
  0x61   : > { %p4088_p9 = pneg %p4087_p4 }
  0x62   : > { %p4094_p12 = por %p4093_p7, %p4092_p0 }
  0x64   : > { %p4095_p2 = pnand %p4094_p12, %p4088_p9 }
  0x66   : > { %4098 = shalt.err (!%p4095_p2)
}
  0x67   : > { %s4099_s0 = scalar_lea.vmem %s4388_s14, 2048  ;;  %s4190_s16 = smov [#allocation8]  }
  0x68   : > { %p4100_p3 = scmp.ne.s32.totalorder %s4388_s14, %s4099_s0  ;;  %s4104_s28 = sshll.u32 %s4190_s16, 4  ;;  %s4105_s28 = int_to_ptr.vmem [resolvable:$false] %s4104_s28 }
  0x69   : > { %s4106_s5 = scalar_lea.vmem %s4105_s28, 4096  ;;  %p4107_p1 = scmp.lt.s32.totalorder %s4388_s14, %s4105_s28 }
  0x6a   : > { %p4102_p5 = pnand %p4100_p3, %p4354_p10  ;;  %p4108_p4 = scmp.lt.s32.totalorder %s4106_s5, %s4099_s0 }
  0x6c   : > { %p4103_p6 = pneg %p4102_p5  ;;  %p4109_p11 = por %p4108_p4, %p4107_p1 }
  0x6e   : > { %p4110_p13 = pnand %p4109_p11, %p4103_p6 }
  0x70   : > { %4113 = shalt.err (!%p4110_p13)
}
  0x71   : > { %3759 = dma.hbm_to_vmem [thread:$0]  (!%p4330_p8), %s4383_s21, 2048, %s4388_s14, %s4348_s23, %s4188_s29, %s4188_s29, %s4189_s15  }
  0x72   : > { %p5153_p10 = scmp.ne.s32.totalorder %s5151_s1, 0 }
  0x73   : > { %s596_s19 = sand.u32 (!%p5153_p10), 1, %s4174_s22   ;;  %p5154_p9 = scmp.ne.s32.totalorder (!%p5153_p10), %s5144_s30, 0 }
  0x74   : > { %594 = sbr.rel (%p5153_p10) target bundleno = 4242 (0x1092), region = 84  ;;  %s3350_s27 = sshll.u32 (!%p5153_p10), %s596_s19, 6 }
  0x75   : > { %s597_s20 = scalar_lea.sflag (!%p5153_p10), [#allocation4], %s596_s19  ;;  %s4459_s26 = scalar_lea.vmem (!%p5153_p10), [#allocation3], %s3350_s27 }
  0x7b   : > { %4157 = dma.done.wait (%p5154_p9), %s597_s20, 1024  }
  0x7c   : > { %4159 = vsyncadd (%p5154_p9), %s597_s20, 4294966272  ;;  %s605_s17 = sand.u32 1, %s4306_s25   ;;  %s3351_s18 = sshll.u32 %s596_s19, 7 }
  0x7d   : > { %s606_s14 = scalar_lea.sflag [#allocation7], %s605_s17  ;;  %s4466_s23 = scalar_lea.vmem [#allocation6], %s3351_s18 }
  0x7e   : > { %4161 = dma.done.wait (%p5154_p9), %s606_s14, 4096  }
  0x7f   : > { %4163 = vsyncadd (%p5154_p9), %s606_s14, 4294963200  ;;  %p699_p8 = scmp.lt.s32.totalorder %s4306_s25, 1  ;;  %s5155_s2 = sld [smem:[#allocation18_spill]] }
  0x80   : > { %p3355_p0 = scmp.ne.s32.totalorder %s4306_s25, 0 }
  0x81   : > { %s4474_s1 = scalar_select %p699_p8, %s4306_s25, 1 }
  0x82   : > { %730 = sbr.rel (%p3355_p0) target bundleno = 139 (0x8b), region = 100  ;;  %s5156_s27 = sld [smem:[#allocation16_spill]] (!%p3355_p0) }
  0x83   : > { %s3739_s21 = smul.u32 192, %s4474_s1  ;;  %s3354_s30 = sshll.u32 %s4474_s1, 1 }
  0x84   : > { %s4494_s17 = scalar_lea.vmem %s5111_s6, %s3354_s30  ;;  %s716_s29 = scalar_lea.vmem %s5114_s9, %s4474_s1 }
  0x85   : > { %s4489_s19 = scalar_lea.vmem %s5155_s2, %s3739_s21  ;;  %s719_s7 = scalar_lea.vmem %s5115_s10, %s4474_s1 }
  0x86   : > { %s722_s16 = scalar_lea.vmem %s5116_s11, %s4474_s1  ;;  %s725_s5 = scalar_lea.vmem %s5117_s12, %s4474_s1 }
  0x87   : > { %s4512_s2 = scalar_lea.vmem [#allocation8], %s3351_s18 }
  0x88   : > { %v731_v0 = vld [vmem:[%s5156_s27] sm:$0xff] (!%p3355_p0)  ;;  %v732_v1 = vld [vmem:[%s5156_s27 + $0x8] sm:$0xff] (!%p3355_p0)  ;;  %v733_v2 = vld [vmem:[%s5156_s27 + $0x10] sm:$0xff] (!%p3355_p0) }
  0x89   : > { %735 = vst [vmem:[#allocation2] sm:$0xff] %v731_v0  ;;  %736 = vst [vmem:[#allocation2 + $0x8] sm:$0xff] %v732_v1  ;;  %v734_v3 = vld [vmem:[%s5156_s27 + $0x18] sm:$0xff] }
  0x8a   : > { %737 = vst [vmem:[#allocation2 + $0x10] sm:$0xff] %v733_v2  ;;  %738 = vst [vmem:[#allocation2 + $0x18] sm:$0xff] %v734_v3 }
  0x8b PF: > { %v3812_v8 = vld [vmem:[%s4489_s19 + $0x4] ss:$12 sps:$4 sm:$0xff]   ;;  %v3814_v9 = vld [vmem:[%s4489_s19] ss:$12 sps:$4 sm:$0xff]   ;;  %v3815_v10 = vld [vmem:[%s4489_s19 + $0x1c] ss:$12 sps:$4 sm:$0xff]   ;;  %s5166_s15 = scalar_lea.vmem %s5109_s4, %s4474_s1 }
  0x8c   : > { %v3817_v11 = vld [vmem:[%s4489_s19 + $0x8] ss:$12 sps:$4 sm:$0xff]   ;;  %972 = vmatprep.subr.bf16.mxu0 %v3812_v8  ;;  %v3818_v28 = vld [vmem:[%s4489_s19 + $0x18] ss:$12 sps:$4 sm:$0xff]   ;;  %v3821_v30 = vld [vmem:[%s4489_s19 + $0x20] ss:$12 sps:$4 sm:$0xff]  }
  0x8d   : > { %973 = vmatpush1.bf16.msra.mxu0 %v3814_v9  ;;  %3563 = vmatprep.subr.bf16.mxu1 %v3817_v11  ;;  %v3819_v29 = vld [vmem:[%s4489_s19 + $0x34] ss:$12 sps:$4 sm:$0xff]   ;;  %v3822_v31 = vld [vmem:[%s4489_s19 + $0x30] ss:$12 sps:$4 sm:$0xff]   ;;  %v3823_v32 = vld [vmem:[%s4489_s19 + $0x4c] ss:$12 sps:$4 sm:$0xff]  }
  0x8e   : > { %974 = vmatprep.subr.bf16.mxu0 %v3815_v10  ;;  %3564 = vmatpush3.bf16.msra.mxu1 %v3817_v11  ;;  %v3825_v33 = vld [vmem:[%s4489_s19 + $0x38] ss:$12 sps:$4 sm:$0xff]   ;;  %v3826_v34 = vld [vmem:[%s4489_s19 + $0x48] ss:$12 sps:$4 sm:$0xff]   ;;  %v3829_v36 = vld [vmem:[%s4489_s19 + $0x50] ss:$12 sps:$4 sm:$0xff]  }
  0x8f   : > { %3565 = vmatprep.subr.bf16.mxu1 %v3821_v30  ;;  %v3827_v35 = vld [vmem:[%s4489_s19 + $0x64] ss:$12 sps:$4 sm:$0xff]   ;;  %v3830_v37 = vld [vmem:[%s4489_s19 + $0x60] ss:$12 sps:$4 sm:$0xff]   ;;  %v3831_v38 = vld [vmem:[%s4489_s19 + $0x7c] ss:$12 sps:$4 sm:$0xff]  }
  0x90   : > { %v3833_v39 = vld [vmem:[%s4489_s19 + $0x68] ss:$12 sps:$4 sm:$0xff]   ;;  %v3834_v40 = vld [vmem:[%s4489_s19 + $0x78] ss:$12 sps:$4 sm:$0xff]   ;;  %v3837_v42 = vld [vmem:[%s4489_s19 + $0x80] ss:$12 sps:$4 sm:$0xff]  }
  0x91   : > { %v741_v5 = vld [vmem:[#allocation2 + $0x10] sm:$0xff]  ;;  %v742_v7 = vld [vmem:[#allocation2 + $0x18] sm:$0xff]  ;;  %975 = vmatpush1.bf16.msra.mxu0 %v3818_v28  ;;  %v4191_v43 = vmov 0   ;;  %v3356_v63 = vld [vmem:[%s716_s29] ss:$0 sm:$0xff]  ;;  %vm4193_vm0 = vmmov 0  }
  0x92   : > { %v739_v4 = vld [vmem:[#allocation2] sm:$0xff]  ;;  %v740_v6 = vld [vmem:[#allocation2 + $0x8] sm:$0xff]  ;;  %747 = vadd.xlane.f32.xlu1 %v741_v5  ;;  %976 = vmatprep.subr.bf16.mxu0 %v3819_v29  ;;  %v3838_v44 = vld [vmem:[%s4489_s19 + $0x90] ss:$12 sps:$4 sm:$0xff]   ;;  %s5157_s30 = sld [smem:[#allocation17_spill]]  ;;  %vm1150_vm1 = vcmask 261120  }
  0x93   : > { %743 = vadd.xlane.f32.xlu0 %v739_v4  ;;  %3566 = vmatpush3.bf16.msra.mxu1 %v3821_v30  ;;  %v3835_v41 = vld [vmem:[%s4489_s19 + $0x94] ss:$12 sps:$4 sm:$0xff]   ;;  %v3839_v45 = vld [vmem:[%s4489_s19 + $0xac] ss:$12 sps:$4 sm:$0xff]   ;;  %v3843_v48 = vld [vmem:[%s4489_s19 + $0xb0] ss:$12 sps:$4 sm:$0xff]  }
  0x94   : > { %3567 = vmatprep.subr.bf16.mxu1 %v3825_v33  ;;  %1004 = vmatprep.mubr.bf16.mxu0 %v4191_v43  ;;  %v3841_v46 = vld [vmem:[%s4489_s19 + $0x98] ss:$12 sps:$4 sm:$0xff]   ;;  %v3842_v47 = vld [vmem:[%s4489_s19 + $0xa8] ss:$12 sps:$4 sm:$0xff]   ;;  %vm1249_vm7 = vcmask 130048   ;;  %s4195_s3 = smov 96  }
  0x95   : > { %977 = vmatpush1.bf16.msra.mxu0 %v3822_v31  ;;  %3811 = vset.pattern.permute.xlu1 %v4191_v43  ;;  %s4196_s20 = smov 64   ;;  %s4197_s24 = smov 32  }
  0x96   : > { %749 = vadd.xlane.f32.xlu1 %v742_v7  ;;  %978 = vmatprep.subr.bf16.mxu0 %v3823_v32  ;;  %p3451_p7 = scmp.ne.s32.totalorder %s4306_s25, 1 }
  0x97   : > { %745 = vadd.xlane.f32.xlu0 %v740_v6  ;;  %3568 = vmatpush3.bf16.msra.mxu1 %v3825_v33  ;;  %s5168_s0 = sld [smem:[#allocation22_spill]] (!%p3451_p7)  ;;  %s5169_s18 = sld [smem:[#allocation23_spill]] (!%p3451_p7) }
  0x98   : > { %3569 = vmatprep.subr.bf16.mxu1 %v3829_v36  ;;  %3810 = vset.pattern.permute.xlu0 %v4191_v43 }
  0x99   : > { %979 = vmatpush1.bf16.msra.mxu0 %v3826_v34 }
  0x9a   : > { %980 = vmatprep.subr.bf16.mxu0 %v3827_v35 }
  0x9b   : > { %3570 = vmatpush3.bf16.msra.mxu1 %v3829_v36 }
  0x9c   : > { %3571 = vmatprep.subr.bf16.mxu1 %v3833_v39 }
  0x9d   : > { %981 = vmatpush1.bf16.msra.mxu0 %v3830_v37 }
  0x9e   : > { %982 = vmatprep.subr.bf16.mxu0 %v3831_v38 }
  0x9f   : > { %3572 = vmatpush3.bf16.msra.mxu1 %v3833_v39 }
  0xa0   : > { %3573 = vmatprep.subr.bf16.mxu1 %v3837_v42 }
  0xa1   : > { %983 = vmatpush1.bf16.msra.mxu0 %v3834_v40 }
  0xa2   : > { %984 = vmatprep.subr.bf16.mxu0 %v3835_v41 }
  0xa3   : > { %3574 = vmatpush3.bf16.msra.mxu1 %v3837_v42 }
  0xa4   : > { %3575 = vmatprep.subr.bf16.mxu1 %v3841_v46 }
  0xa5   : > { %985 = vmatpush1.bf16.msra.mxu0 %v3838_v44 }
  0xa6   : > { %986 = vmatprep.subr.bf16.mxu0 %v3839_v45 }
  0xa7   : > { %3576 = vmatpush3.bf16.msra.mxu1 %v3841_v46 }
  0xa8   : > { %3577 = vmatprep.subr.bf16.mxu1 %v3843_v48 }
  0xa9   : > { %987 = vmatpush1.bf16.msra.mxu0 %v3842_v47 }
  0xab   : > { %3578 = vmatpush3.bf16.msra.mxu1 %v3843_v48 }
 0x11f   : > { %v748_v13 = vpop.xlane.xlu1 %747 }
 0x120   : > { %v744_v12 = vpop.xlane.xlu0 %743  ;;  %v754_v15 = vmul.f32 0.0078125, %v748_v13 }
 0x121   : > { %v752_v14 = vmul.f32 0.0078125, %v744_v12 }
 0x122   : > { %v4533_v17 = vsub.f32 %v741_v5, %v754_v15 }
 0x123   : > { %v4531_v16 = vsub.f32 %v739_v4, %v752_v14  ;;  %v750_v19 = vpop.xlane.xlu1 %749  ;;  %v3357_v4 = vld [vmem:[%s719_s7] ss:$0 sm:$0xff] }
 0x124   : > { %v746_v18 = vpop.xlane.xlu0 %745  ;;  %v755_v22 = vmul.f32 0.0078125, %v750_v19  ;;  %v762_v25 = vmul.f32 %v4533_v17, %v4533_v17  ;;  %v4194_v19 = vmov 1966171168  }
 0x125   : > { %v753_v20 = vmul.f32 0.0078125, %v746_v18  ;;  %v760_v21 = vmul.f32 %v4531_v16, %v4531_v16  ;;  %v4192_v18 = vmov 0.0  }
 0x126   : > { %v4539_v24 = vsub.f32 %v742_v7, %v755_v22  ;;  %3583 = vmatprep.subr.bf16.mxu1 %v4192_v18  ;;  %3589 = vmatprep.subr.bf16.mxu0 %v4192_v18  ;;  %v3382_v22 = vld.sshfl [vmem:[%s5157_s30] sm:$0x11 pattern:$0x75316420] }
 0x127   : > { %v4537_v23 = vsub.f32 %v740_v6, %v753_v20  ;;  %764 = vadd.xlane.f32.xlu0 %v760_v21  ;;  %v1099_v20 = vunpack.c.l.s4 %v4194_v19 }
 0x128   : > { %v763_v27 = vmul.f32 %v4539_v24, %v4539_v24 }
 0x129   : > { %v761_v26 = vmul.f32 %v4537_v23, %v4537_v23 }
 0x12b   : > { %768 = vadd.xlane.f32.xlu0 %v762_v25  ;;  %766 = vadd.xlane.f32.xlu1 %v761_v26 }
 0x12f   : > { %770 = vadd.xlane.f32.xlu1 %v763_v27 }
 0x1b4   : > { %v765_v49 = vpop.xlane.xlu0 %764 }
 0x1b5   : > { %v772_v50 = vmul.f32 0.0078125, %v765_v49 }
 0x1b7   : > { %v776_v51 = vadd.f32 1e-05, %v772_v50 }
 0x1b8   : > { %v767_v52 = vpop.xlane.xlu1 %766  ;;  %v769_v53 = vpop.xlane.xlu0 %768 }
 0x1b9   : > { %3892 = vrsqrt.f32 %v776_v51  ;;  %v773_v54 = vmul.f32 0.0078125, %v767_v52  ;;  %v774_v55 = vmul.f32 0.0078125, %v769_v53 }
 0x1bb   : > { %v777_v56 = vadd.f32 1e-05, %v773_v54  ;;  %v778_v57 = vadd.f32 1e-05, %v774_v55 }
 0x1bc   : > { %v771_v58 = vpop.xlane.xlu1 %770 }
 0x1bd   : > { %3894 = vrsqrt.f32 %v777_v56  ;;  %v775_v59 = vmul.f32 0.0078125, %v771_v58 }
 0x1be   : > { %3896 = vrsqrt.f32 %v778_v57 }
 0x1bf   : > { %v779_v60 = vadd.f32 1e-05, %v775_v59 }
 0x1c1   : > { %3898 = vrsqrt.f32 %v779_v60 }
 0x1c3   : > { %v3893_v61 = vpop.eup %3892 }
 0x1c4   : > { %v784_v62 = vmul.f32 %v3893_v61, %v4531_v16 }
 0x1c6   : > { %v795_v3 = vmul.f32 %v3356_v63, %v784_v62 }
 0x1c7   : > { %v3895_v0 = vpop.eup %3894 }
 0x1c8   : > { %v3897_v1 = vpop.eup %3896  ;;  %v785_v2 = vmul.f32 %v3895_v0, %v4537_v23  ;;  %v806_v8 = vadd.f32 %v3357_v4, %v795_v3  ;;  %v1100_v23 = vunpack.c.0.s8 %v1099_v20 }
 0x1c9   : > { %v786_v5 = vmul.f32 %v3897_v1, %v4533_v17  ;;  %v1084_v17 = vlaneseq }
 0x1ca   : > { %v796_v6 = vmul.f32 %v3356_v63, %v785_v2 }
 0x1cb   : > { %v3899_v7 = vpop.eup %3898  ;;  %v797_v11 = vmul.f32 %v3356_v63, %v786_v5  ;;  %v4591_v21 = vshrl.u32 %v1084_v17, 7  ;;  %v1088_v56 = vand.u32 127, %v1084_v17 }
 0x1cc   : > { %v807_v9 = vadd.f32 %v3357_v4, %v796_v6  ;;  %v787_v10 = vmul.f32 %v3899_v7, %v4539_v24  ;;  %v1097_v24 = vcombine.high %v3382_v22, %v3382_v22 }
 0x1cd   : > { %v808_v14 = vadd.f32 %v3357_v4, %v797_v11  ;;  %v1103_v25 = vsub.s32 %v1100_v23, %v4591_v21  ;;  %v4598_v26 = vsub.s32 0, %v4591_v21  ;;  %vm1128_vm2 = vcmp.le.s32.totalorder %v1088_v56, %v4591_v21 }
 0x1ce   : > { %v810_v12 = vpack.c.bf16 %v807_v9, %v806_v8  ;;  %v798_v13 = vmul.f32 %v3356_v63, %v787_v10  ;;  %v1086_v59 = vadd.s32 8, %v4591_v21 }
 0x1cf   : > { %v1104_v27 = vrot.slane %v3382_v22, %v1103_v25  ;;  %v1111_v28 = vrot.slane %v1097_v24, %v1103_v25 }
 0x1d0   : > { %1005 = vmatmul.mubr.bf16.vlgmr.msra.gmra.mrb[0].mxu0 %v810_v12  ;;  %3579 = vmatprep.mubr.bf16.mxu1 %v810_v12  ;;  %v809_v15 = vadd.f32 %v3357_v4, %v798_v13  ;;  %vm1129_vm5 = vcmp.le.s32.totalorder %v1088_v56, %v1086_v59 }
 0x1d1   : > { %1014 = vmatprep.mubr.bf16.mxu0 %v4191_v43  ;;  %v1115_v29 = vrot.slane %v1104_v27, %v4598_v26  ;;  %v1119_v30 = vrot.slane %v1111_v28, %v4598_v26 }
 0x1d2   : > { %v811_v16 = vpack.c.bf16 %v809_v15, %v808_v14 }
 0x1d3   : > { %1121 = vperm.xlu1 %3811, %v1115_v29   ;;  %1124 = vperm.xlu0 %3810, %v1119_v30  }
 0x1d4   : > { %3580 = vmatmul.mubr.bf16.vlgmr.msra.gmra.mrb[0].mxu1 %v811_v16 }
 0x1d5   : > { %3585 = vmatprep.mubr.msk.bf16.mxu1 %vm4193_vm0, %v4192_v18 }
 0x1d8   : > { %1015 = vmatmul.mubr.bf16.gmra.mrb[4].mxu0 %v811_v16 }
 0x1d9   : > { %3591 = vmatprep.mubr.msk.bf16.mxu0 %vm4193_vm0, %v4192_v18 }
 0x252   : > { %v1122_v57 = vpop.permute.xlu1 %1121  ;;  %v1125_v62 = vpop.permute.xlu0 %1124 }
 0x253   : > { %vm1126_vm3 = vcmp.lt.s32.totalorder %v1088_v56, %v1122_v57  ;;  %vm1127_vm8 = vcmp.lt.s32.totalorder %v1088_v56, %v1125_v62 }
 0x254   : > { %vm4635_vm4 = vmand %vm1126_vm3, %vm1128_vm2 }
 0x255   : > { %vm4641_vm6 = vmand %vm1126_vm3, %vm1129_vm5 }
 0x256   : > { %vm4650_vm9 = vmand %vm1127_vm8, %vm1128_vm2 }
 0x257   : > { %vm4657_vm10 = vmand %vm1127_vm8, %vm1129_vm5 }
 0x2a3   : > { %v1006_v31 = vpop.f32.mrb[0].mxu0 }
 0x2a4   : > { %v1008_v32 = vpop.f32.mrb[1].mxu0  ;;  %v1074_v34 = vmul.f32 0.17677669, %v1006_v31 }
 0x2a5   : > { %v1010_v33 = vpop.f32.mrb[2].mxu0 }
 0x2a6   : > { %v1075_v35 = vmul.f32 0.17677669, %v1010_v33  ;;  %v1012_v36 = vpop.f32.mrb[3].mxu0 }
 0x2a7   : > { %v4602_v37 = vpack.c.bf16 %v1012_v36, %v1008_v32  ;;  %v3581_v38 = vpop.f32.mrb[0].mxu1 }
 0x2a8   : > { %v4604_v39 = vpack.c.bf16 %v1075_v35, %v1074_v34  ;;  %v1059_v40 = vpop.f32.mrb[1].mxu1 }
 0x2a9   : > { %v3582_v41 = vpop.f32.mrb[2].mxu1  ;;  %v1155_v42 = vsel %vm1150_vm1, %v4602_v37, 0 }
 0x2aa   : > { %v4608_v44 = vpack.c.bf16 %v3582_v41, %v3581_v38  ;;  %v1062_v45 = vpop.f32.mrb[3].mxu1  ;;  %3584 = vmatpush3.bf16.xpose.msra.mxu1 %v1155_v42 }
 0x2ab   : > { %v4610_v46 = vpack.c.bf16 %v1062_v45, %v1059_v40  ;;  %v1016_v47 = vpop.f32.mrb[4].mxu0  ;;  %3595 = vmatprep.subr.bf16.mxu1 %v4192_v18 }
 0x2ac   : > { %v1018_v48 = vpop.f32.mrb[5].mxu0  ;;  %v1076_v50 = vmul.f32 0.17677669, %v1016_v47 }
 0x2ad   : > { %v1020_v49 = vpop.f32.mrb[6].mxu0 }
 0x2ae   : > { %v1077_v51 = vmul.f32 0.17677669, %v1020_v49  ;;  %v1022_v52 = vpop.f32.mrb[7].mxu0 }
 0x2af   : > { %v4613_v53 = vpack.c.bf16 %v1022_v52, %v1018_v48 }
 0x2b0   : > { %v4615_v54 = vpack.c.bf16 %v1077_v51, %v1076_v50 }
 0x2b1   : > { %3586 = vmatmul.mubr.msk.bf16.vlgmr.msra.gmra.mrb[4].mxu1 %vm1150_vm1, %v4604_v39  ;;  %v1202_v55 = vsel %vm1150_vm1, %v4613_v53, 0 }
 0x2b2   : > { %3590 = vmatpush3.bf16.xpose.msra.mxu0 %v1202_v55  ;;  %3596 = vmatpush3.bf16.msra.mxu1 %v4610_v46 }
 0x2b3   : > { %3601 = vmatprep.subr.bf16.mxu0 %v4192_v18  ;;  %3597 = vmatprep.mubr.msk.bf16.mxu1 %vm4193_vm0, %v4192_v18 }
 0x2b4   : > { %3607 = vmatprep.subr.bf16.mxu1 %v4192_v18 }
 0x2b9   : > { %3592 = vmatmul.mubr.msk.bf16.vlgmr.msra.gmra.mrb[8].mxu0 %vm1150_vm1, %v4615_v54 }
 0x2ba   : > { %3602 = vmatpush3.bf16.msra.mxu0 %v4608_v44  ;;  %3603 = vmatprep.mubr.msk.bf16.mxu0 %vm4193_vm0, %v4192_v18 }
 0x2bb   : > { %3613 = vmatprep.subr.bf16.mxu0 %v4192_v18 }
 0x384   : > { %v1191_v61 = vpop.f32.mrb[4].mxu1 }
 0x385   : > { %v3587_v63 = vpop.f32.mrb[5].mxu1  ;;  %v1245_v14 = vsel %vm4635_vm4, %v1191_v61, -1e+09 }
 0x386   : > { %v1194_v0 = vpop.f32.mrb[6].mxu1  ;;  %v1250_v15 = vsel %vm1249_vm7, %v1245_v14, -inf }
 0x387   : > { %v1246_v1 = vsel %vm4641_vm6, %v1194_v0, -1e+09  ;;  %v3588_v2 = vpop.f32.mrb[7].mxu1 }
 0x388   : > { %v1253_v3 = vsel %vm1249_vm7, %v1246_v1, -inf }
 0x389   : > { %1254 = vmax.xlane.f32.xlu0 %v1253_v3 }
 0x38c   : > { %v1238_v5 = vpop.f32.mrb[8].mxu0 }
 0x38d   : > { %v1247_v6 = vsel %vm4650_vm9, %v1238_v5, -1e+09  ;;  %v3593_v7 = vpop.f32.mrb[9].mxu0 }
 0x38e   : > { %v1241_v9 = vpop.f32.mrb[10].mxu0  ;;  %v1256_v10 = vsel %vm1249_vm7, %v1247_v6, -inf }
 0x38f   : > { %v1248_v11 = vsel %vm4657_vm10, %v1241_v9, -1e+09  ;;  %v3594_v12 = vpop.f32.mrb[11].mxu0  ;;  %1257 = vmax.xlane.f32.xlu1 %v1256_v10 }
 0x390   : > { %v1259_v13 = vsel %vm1249_vm7, %v1248_v11, -inf }
 0x393   : > { %1260 = vmax.xlane.f32.xlu1 %v1259_v13 }
 0x39f   : > { %1387 = vrot.lane.b32.xlu0 %v4604_v39, %s4195_s3 }
 0x3a4   : > { %1443 = vrot.lane.b32.xlu1 %v4613_v53, %s4195_s3 }
 0x3a8   : > { %1440 = vrot.lane.b32.xlu1 %v4615_v54, %s4195_s3 }
 0x3cc   : > { %1251 = vmax.xlane.f32.xlu1 %v1250_v15 }
 0x3dd   : > { %1390 = vrot.lane.b32.xlu1 %v4602_v37, %s4195_s3 }
 0x3e1   : > { %1587 = vrot.lane.b32.xlu1 %v4608_v44, %s4195_s3 }
 0x416   : > { %v1255_v31 = vpop.xlane.xlu0 %1254 }
 0x417   : > { %v1263_v32 = vsub.f32 %v1246_v1, %v1255_v31 }
 0x419   : > { %v1268_v33 = vmul.f32 1.442695, %v1263_v32 }
 0x41a   : > { %v1388_v48 = vpop.permute.xlu0 %1387 }
 0x41c   : > { %v1258_v16 = vpop.xlane.xlu1 %1257 }
 0x41d   : > { %v1264_v17 = vsub.f32 %v1247_v6, %v1258_v16 }
 0x41f   : > { %v1270_v19 = vmul.f32 1.442695, %v1264_v17 }
 0x420   : > { %v1261_v20 = vpop.xlane.xlu1 %1260 }
 0x421   : > { %v1265_v22 = vsub.f32 %v1248_v11, %v1261_v20  ;;  %3900 = vpow2.f32 %v1270_v19 }
 0x423   : > { %v1272_v23 = vmul.f32 1.442695, %v1265_v22 }
 0x424   : > { %v1444_v27 = vpop.permute.xlu1 %1443 }
 0x425   : > { %3902 = vpow2.f32 %v1272_v23  ;;  %v1449_v29 = vsel %vm1150_vm1, %v1444_v27, 0 }
 0x426   : > { %3904 = vpow2.f32 %v1268_v33 }
 0x428   : > { %v1441_v30 = vpop.permute.xlu1 %1440 }
 0x42b   : > { %v4678_v24 = vpop.eup %3900 }
 0x42c   : > { %v1280_v16 = vsel %vm1249_vm7, %v4678_v24, 0.0 }
 0x42f   : > { %v4680_v25 = vpop.eup %3902 }
 0x430   : > { %v1291_v28 = vpack.c.bf16 %v4680_v25, %v4678_v24  ;;  %v3905_v41 = vpop.eup %3904  ;;  %v1283_v17 = vsel %vm1249_vm7, %v4680_v25, 0.0 }
 0x431   : > { %v1277_v15 = vsel %vm1249_vm7, %v3905_v41, 0.0 }
 0x432   : > { %3604 = vmatmul.mubr.msk.bf16.vlgmr.msra.gmra.mrb[12].mxu0 %vm1249_vm7, %v1291_v28 }
 0x433   : > { %3614 = vmatpush3.bf16.xpose.msra.mxu0 %v1449_v29  ;;  %3615 = vmatprep.mubr.msk.bf16.mxu0 %vm4193_vm0, %v4192_v18 }
 0x434   : > { %3625 = vmatprep.subr.bf16.mxu0 %v4192_v18 }
 0x43a   : > { %3616 = vmatmul.mubr.msk.bf16.vlgmr.msra.gmra.mrb[16].mxu0 %vm1150_vm1, %v1441_v30 }
 0x43b   : > { %3627 = vmatprep.mubr.msk.bf16.mxu0 %vm4193_vm0, %v4192_v18 }
 0x459   : > { %v1252_v34 = vpop.xlane.xlu1 %1251 }
 0x45a   : > { %v1262_v35 = vsub.f32 %v1245_v14, %v1252_v34 }
 0x45c   : > { %v1266_v36 = vmul.f32 1.442695, %v1262_v35 }
 0x45d   : > { %v1391_v38 = vpop.permute.xlu1 %1390 }
 0x45e   : > { %3906 = vpow2.f32 %v1266_v36  ;;  %v1396_v47 = vsel %vm1150_vm1, %v1391_v38, 0 }
 0x461   : > { %v1588_v40 = vpop.permute.xlu1 %1587 }
 0x462   : > { %3626 = vmatpush3.bf16.msra.mxu0 %v1588_v40 }
 0x463   : > { %3647 = vmatprep.subr.bf16.mxu0 %v4192_v18 }
 0x468   : > { %v3907_v42 = vpop.eup %3906 }
 0x469   : > { %v1290_v45 = vpack.c.bf16 %v3905_v41, %v3907_v42  ;;  %v1274_v19 = vsel %vm1249_vm7, %v3907_v42, 0.0 }
 0x46b   : > { %3598 = vmatmul.mubr.msk.bf16.vlgmr.msra.gmra.mrb[8].mxu1 %vm1249_vm7, %v1290_v45 }
 0x46c   : > { %3608 = vmatpush3.bf16.xpose.msra.mxu1 %v1396_v47  ;;  %3609 = vmatprep.mubr.msk.bf16.mxu1 %vm4193_vm0, %v4192_v18 }
 0x46d   : > { %3619 = vmatprep.subr.bf16.mxu1 %v4192_v18 }
 0x473   : > { %3610 = vmatmul.mubr.msk.bf16.vlgmr.msra.gmra.mrb[12].mxu1 %vm1150_vm1, %v1388_v48 }
 0x474   : > { %3621 = vmatprep.mubr.msk.bf16.mxu1 %vm4193_vm0, %v4192_v18 }
 0x505   : > { %v4701_v49 = vpop.f32.mrb[12].mxu0 }
 0x506   : > { %v3605_v50 = vpop.f32.mrb[13].mxu0 }
 0x507   : > { %v4703_v51 = vpop.f32.mrb[14].mxu0 }
 0x508   : > { %v3606_v52 = vpop.f32.mrb[15].mxu0 }
 0x50d   : > { %v1485_v55 = vpop.f32.mrb[16].mxu0 }
 0x50e   : > { %v1494_v56 = vsel %vm4650_vm9, %v1485_v55, -1e+09  ;;  %v3617_v57 = vpop.f32.mrb[17].mxu0 }
 0x50f   : > { %v1488_v59 = vpop.f32.mrb[18].mxu0  ;;  %v1502_v61 = vsel %vm1249_vm7, %v1494_v56, -inf }
 0x510   : > { %v1495_v62 = vsel %vm4657_vm10, %v1488_v59, -1e+09  ;;  %1503 = vmax.xlane.f32.xlu1 %v1502_v61  ;;  %v3618_v63 = vpop.f32.mrb[19].mxu0 }
 0x511   : > { %v1505_v0 = vsel %vm1249_vm7, %v1495_v62, -inf }
 0x512   : > { %1506 = vmax.xlane.f32.xlu0 %v1505_v0 }
 0x521   : > { %1774 = vrot.lane.b32.xlu1 %v4604_v39, %s4196_s20 }
 0x525   : > { %1827 = vrot.lane.b32.xlu1 %v4613_v53, %s4196_s20 }
 0x528   : > { %1776 = vrot.lane.b32.xlu0 %v4602_v37, %s4196_s20 }
 0x529   : > { %1825 = vrot.lane.b32.xlu1 %v4615_v54, %s4196_s20 }
 0x53e   : > { %v4719_v1 = vpop.f32.mrb[8].mxu1 }
 0x53f   : > { %v3599_v2 = vpop.f32.mrb[9].mxu1 }
 0x540   : > { %v4721_v3 = vpop.f32.mrb[10].mxu1 }
 0x541   : > { %v3600_v5 = vpop.f32.mrb[11].mxu1 }
 0x546   : > { %v1432_v6 = vpop.f32.mrb[12].mxu1 }
 0x547   : > { %v1492_v7 = vsel %vm4635_vm4, %v1432_v6, -1e+09  ;;  %v3611_v9 = vpop.f32.mrb[13].mxu1 }
 0x548   : > { %v1435_v10 = vpop.f32.mrb[14].mxu1  ;;  %v1496_v11 = vsel %vm1249_vm7, %v1492_v7, -inf }
 0x549   : > { %v1493_v12 = vsel %vm4641_vm6, %v1435_v10, -1e+09  ;;  %1497 = vmax.xlane.f32.xlu0 %v1496_v11  ;;  %v3612_v13 = vpop.f32.mrb[15].mxu1 }
 0x54a   : > { %v1499_v14 = vsel %vm1249_vm7, %v1493_v12, -inf }
 0x54d   : > { %1500 = vmax.xlane.f32.xlu1 %v1499_v14 }
 0x551   : > { %1278 = vadd.xlane.f32.xlu1 %v1277_v15  ;;  %v3844_v15 = vld [vmem:[%s4459_s26 + $0x10] sm:$0xff]  }
 0x555   : > { %1281 = vadd.xlane.f32.xlu1 %v1280_v16  ;;  %v3845_v16 = vld [vmem:[%s4459_s26 + $0x18] sm:$0xff]  }
 0x559   : > { %1284 = vadd.xlane.f32.xlu1 %v1283_v17  ;;  %v3846_v17 = vld [vmem:[%s4459_s26] sm:$0xff]  }
 0x55f   : > { %1539 = vrot.lane.b32.xlu0 %v4610_v46, %s4195_s3 }
 0x57e   : > { %1275 = vadd.xlane.f32.xlu0 %v1274_v19 }
 0x594   : > { %1969 = vrot.lane.b32.xlu0 %v4608_v44, %s4196_s20 }
 0x59d   : > { %v1504_v20 = vpop.xlane.xlu1 %1503 }
 0x59e   : > { %v1510_v22 = vsub.f32 %v1494_v56, %v1504_v20 }
 0x59f   : > { %v1507_v23 = vpop.xlane.xlu0 %1506 }
 0x5a0   : > { %v1516_v27 = vmul.f32 1.442695, %v1510_v22  ;;  %v1511_v28 = vsub.f32 %v1495_v62, %v1507_v23 }
 0x5a1   : > { %v1775_v32 = vpop.permute.xlu1 %1774 }
 0x5a2   : > { %v1518_v24 = vmul.f32 1.442695, %v1511_v28  ;;  %3908 = vpow2.f32 %v1516_v27 }
 0x5a3   : > { %v1777_v30 = vpop.permute.xlu0 %1776 }
 0x5a4   : > { %3910 = vpow2.f32 %v1518_v24  ;;  %v1782_v33 = vsel %vm1150_vm1, %v1777_v30, 0 }
 0x5a5   : > { %v1828_v34 = vpop.permute.xlu1 %1827 }
 0x5a6   : > { %v1833_v35 = vsel %vm1150_vm1, %v1828_v34, 0 }
 0x5a9   : > { %v1826_v36 = vpop.permute.xlu1 %1825 }
 0x5ac   : > { %v3909_v29 = vpop.eup %3908 }
 0x5ad   : > { %v1526_v63 = vsel %vm1249_vm7, %v3909_v29, 0.0 }
 0x5ae   : > { %v3911_v25 = vpop.eup %3910 }
 0x5af   : > { %v1537_v31 = vpack.c.bf16 %v3911_v25, %v3909_v29 }
 0x5b1   : > { %3628 = vmatmul.mubr.msk.bf16.vlgmr.msra.gmra.mrb[20].mxu0 %vm1249_vm7, %v1537_v31 }
 0x5b2   : > { %3648 = vmatpush3.bf16.xpose.msra.mxu0 %v1782_v33  ;;  %3649 = vmatprep.mubr.msk.bf16.mxu0 %vm4193_vm0, %v4192_v18 }
 0x5b3   : > { %3653 = vmatprep.subr.bf16.mxu0 %v4192_v18 }
 0x5b9   : > { %3650 = vmatmul.mubr.msk.bf16.vlgmr.msra.gmra.mrb[24].mxu0 %vm1150_vm1, %v1775_v32 }
 0x5ba   : > { %3654 = vmatpush3.bf16.xpose.msra.mxu0 %v1833_v35  ;;  %3655 = vmatprep.mubr.msk.bf16.mxu0 %vm4193_vm0, %v4192_v18 }
 0x5bb   : > { %3665 = vmatprep.subr.bf16.mxu0 %v4192_v18 }
 0x5c1   : > { %3656 = vmatmul.mubr.msk.bf16.vlgmr.msra.gmra.mrb[28].mxu0 %vm1150_vm1, %v1826_v36 }
 0x5c2   : > { %3667 = vmatprep.mubr.msk.bf16.mxu0 %vm4193_vm0, %v4192_v18 }
 0x5d6   : > { %v1498_v38 = vpop.xlane.xlu0 %1497 }
 0x5d7   : > { %v1508_v40 = vsub.f32 %v1492_v7, %v1498_v38  ;;  %v1529_v7 = vsel %vm1249_vm7, %v3911_v25, 0.0 }
 0x5d9   : > { %v1512_v41 = vmul.f32 1.442695, %v1508_v40 }
 0x5da   : > { %v1501_v42 = vpop.xlane.xlu1 %1500  ;;  %v1540_v45 = vpop.permute.xlu0 %1539 }
 0x5db   : > { %3912 = vpow2.f32 %v1512_v41  ;;  %v1509_v47 = vsub.f32 %v1493_v12, %v1501_v42  ;;  %3620 = vmatpush3.bf16.msra.mxu1 %v1540_v45 }
 0x5dc   : > { %3631 = vmatprep.subr.bf16.mxu1 %v3844_v15 }
 0x5dd   : > { %v1514_v48 = vmul.f32 1.442695, %v1509_v47 }
 0x5de   : > { %v1279_v50 = vpop.xlane.xlu1 %1278 }
 0x5df   : > { %3914 = vpow2.f32 %v1514_v48 }
 0x5e2   : > { %v1282_v52 = vpop.xlane.xlu1 %1281 }
 0x5e3   : > { %3916 = vrcp.f32 %v1282_v52 }
 0x5e5   : > { %v3913_v55 = vpop.eup %3912 }
 0x5e6   : > { %v1285_v56 = vpop.xlane.xlu1 %1284  ;;  %v1520_v57 = vsel %vm1249_vm7, %v3913_v55, 0.0 }
 0x5e7   : > { %3918 = vrcp.f32 %v1285_v56  ;;  %1521 = vadd.xlane.f32.xlu1 %v1520_v57 }
 0x5e8   : > { %3920 = vrcp.f32 %v1279_v50 }
 0x5e9   : > { %v3915_v59 = vpop.eup %3914 }
 0x5ea   : > { %v1523_v61 = vsel %vm1249_vm7, %v3915_v59, 0.0  ;;  %v1536_v62 = vpack.c.bf16 %v3915_v59, %v3913_v55 }
 0x5eb   : > { %1524 = vadd.xlane.f32.xlu1 %v1523_v61 }
 0x5ec   : > { %3622 = vmatmul.mubr.msk.bf16.vlgmr.msra.gmra.mrb[16].mxu1 %vm1249_vm7, %v1536_v62 }
 0x5ed   : > { %v3917_v0 = vpop.eup %3916  ;;  %3632 = vmatpush3.bf16.msra.mxu1 %v3844_v15 }
 0x5ee   : > { %v4757_v5 = vmul.f32 %v3917_v0, %v4701_v49  ;;  %3633 = vmatprep.subr.bf16.mxu1 %v3845_v16 }
 0x5ef   : > { %1527 = vadd.xlane.f32.xlu1 %v1526_v63 }
 0x5f1   : > { %v3919_v2 = vpop.eup %3918  ;;  %3634 = vmatpush3.bf16.msra.mxu1 %v3845_v16 }
 0x5f2   : > { %v4760_v6 = vmul.f32 %v3919_v2, %v4703_v51  ;;  %v3921_v49 = vpop.eup %3920  ;;  %3639 = vmatprep.subr.bf16.mxu1 %v3846_v17 }
 0x5f3   : > { %1530 = vadd.xlane.f32.xlu1 %v1529_v7  ;;  %v4770_v13 = vmul.f32 %v3921_v49, %v4721_v3 }
 0x5f4   : > { %v1385_v9 = vpack.c.bf16 %v4760_v6, %v4757_v5 }
 0x60b   : > { %v1276_v10 = vpop.xlane.xlu0 %1275 }
 0x60c   : > { %3922 = vrcp.f32 %v1276_v10 }
 0x60f   : > { %v1970_v11 = vpop.permute.xlu0 %1969 }
 0x610   : > { %3666 = vmatpush3.bf16.msra.mxu0 %v1970_v11  ;;  %v3847_v11 = vld [vmem:[%s4459_s26 + $0x8] sm:$0xff]  }
 0x611   : > { %3679 = vmatprep.subr.bf16.mxu0 %v4192_v18 }
 0x616   : > { %v3923_v12 = vpop.eup %3922 }
 0x617   : > { %v4767_v51 = vmul.f32 %v3923_v12, %v4719_v1 }
 0x619   : > { %v1384_v14 = vpack.c.bf16 %v4770_v13, %v4767_v51 }
 0x674   : > { %v1522_v19 = vpop.xlane.xlu1 %1521 }
 0x678   : > { %v1525_v20 = vpop.xlane.xlu1 %1524 }
 0x67c   : > { %v1528_v22 = vpop.xlane.xlu1 %1527 }
 0x67d   : > { %3924 = vrcp.f32 %v1528_v22 }
 0x680   : > { %v1531_v1 = vpop.xlane.xlu1 %1530 }
 0x681   : > { %3926 = vrcp.f32 %v1531_v1 }
 0x682   : > { %3928 = vrcp.f32 %v1522_v19 }
 0x683   : > { %3930 = vrcp.f32 %v1525_v20 }
 0x684   : > { %v1627_v23 = vpop.f32.mrb[20].mxu0 }
 0x685   : > { %v3629_v3 = vpop.f32.mrb[21].mxu0 }
 0x686   : > { %v1630_v27 = vpop.f32.mrb[22].mxu0 }
 0x687   : > { %v3630_v28 = vpop.f32.mrb[23].mxu0  ;;  %v3925_v24 = vpop.eup %3924 }
 0x688   : > { %v1636_v25 = vmul.f32 %v3925_v24, %v1627_v23 }
 0x68b   : > { %v3927_v29 = vpop.eup %3926 }
 0x68c   : > { %v1637_v30 = vmul.f32 %v3927_v29, %v1630_v27  ;;  %v1818_v31 = vpop.f32.mrb[24].mxu0  ;;  %v3929_v59 = vpop.eup %3928 }
 0x68d   : > { %v1876_v32 = vsel %vm4635_vm4, %v1818_v31, -1e+09  ;;  %v3651_v33 = vpop.f32.mrb[25].mxu0  ;;  %v3931_v62 = vpop.eup %3930 }
 0x68e   : > { %v1639_v34 = vpack.c.bf16 %v1637_v30, %v1636_v25  ;;  %v1821_v35 = vpop.f32.mrb[26].mxu0  ;;  %v1880_v36 = vsel %vm1249_vm7, %v1876_v32, -inf  ;;  %v3849_v33 = vld [vmem:[%s4459_s26 + $0x28] sm:$0xff]  }
 0x68f   : > { %v1877_v38 = vsel %vm4641_vm6, %v1821_v35, -1e+09  ;;  %v3652_v40 = vpop.f32.mrb[27].mxu0  ;;  %1881 = vmax.xlane.f32.xlu1 %v1880_v36 }
 0x690   : > { %v1883_v41 = vsel %vm1249_vm7, %v1877_v38, -inf }
 0x693   : > { %1884 = vmax.xlane.f32.xlu1 %v1883_v41 }
 0x694   : > { %v1869_v42 = vpop.f32.mrb[28].mxu0 }
 0x695   : > { %v1878_v45 = vsel %vm4650_vm9, %v1869_v42, -1e+09  ;;  %v3657_v47 = vpop.f32.mrb[29].mxu0 }
 0x696   : > { %v1872_v48 = vpop.f32.mrb[30].mxu0  ;;  %v1886_v50 = vsel %vm1249_vm7, %v1878_v45, -inf }
 0x697   : > { %v1879_v52 = vsel %vm4657_vm10, %v1872_v48, -1e+09  ;;  %v3658_v55 = vpop.f32.mrb[31].mxu0  ;;  %1887 = vmax.xlane.f32.xlu1 %v1886_v50 }
 0x698   : > { %v1889_v56 = vsel %vm1249_vm7, %v1879_v52, -inf }
 0x69b   : > { %1890 = vmax.xlane.f32.xlu1 %v1889_v56 }
 0x6ac   : > { %1922 = vrot.lane.b32.xlu1 %v4610_v46, %s4196_s20 }
 0x6b0   : > { %2095 = vrot.lane.b32.xlu1 %v4602_v37, %s4197_s24 }
 0x6bf   : > { %v1579_v57 = vpop.f32.mrb[16].mxu1 }
 0x6c0   : > { %v3623_v61 = vpop.f32.mrb[17].mxu1  ;;  %v1634_v0 = vmul.f32 %v3929_v59, %v1579_v57 }
 0x6c1   : > { %v1582_v63 = vpop.f32.mrb[18].mxu1 }
 0x6c2   : > { %v1635_v2 = vmul.f32 %v3931_v62, %v1582_v63  ;;  %v3624_v7 = vpop.f32.mrb[19].mxu1 }
 0x6c4   : > { %v1638_v10 = vpack.c.bf16 %v1635_v2, %v1634_v0 }
 0x6c6   : > { %3635 = vmatprep.mubr.msk.bf16.mxu1 %vm1150_vm1, %v1638_v10 }
 0x6c7   : > { %3636 = vmatmul.mubr.msk.bf16.vlgmr.msra.gmra.mrb[20].mxu1 %vm1150_vm1, %v1639_v34 }
 0x6c8   : > { %3643 = vmatprep.mubr.msk.bf16.mxu1 %vm1150_vm1, %v1384_v14  ;;  %3640 = vmatpush3.bf16.msra.mxu1 %v3846_v17 }
 0x6c9   : > { %3641 = vmatprep.subr.bf16.mxu1 %v3847_v11 }
 0x6cc   : > { %3642 = vmatpush3.bf16.msra.mxu1 %v3847_v11 }
 0x6cd   : > { %3659 = vmatprep.subr.bf16.mxu1 %v4192_v18 }
 0x6d3   : > { %3644 = vmatmul.mubr.msk.bf16.vlgmr.msra.gmra.mrb[20].mxu1 %vm1150_vm1, %v1385_v9 }
 0x6d4   : > { %3661 = vmatprep.mubr.msk.bf16.mxu1 %vm4193_vm0, %v4192_v18 }
 0x71c   : > { %v1882_v37 = vpop.xlane.xlu1 %1881 }
 0x71d   : > { %v1892_v49 = vsub.f32 %v1876_v32, %v1882_v37  ;;  %v3848_v32 = vld [vmem:[%s4459_s26 + $0x20] sm:$0xff]  }
 0x71f   : > { %v1896_v12 = vmul.f32 1.442695, %v1892_v49 }
 0x720   : > { %v1885_v51 = vpop.xlane.xlu1 %1884 }
 0x721   : > { %3932 = vpow2.f32 %v1896_v12  ;;  %v1893_v13 = vsub.f32 %v1877_v38, %v1885_v51 }
 0x723   : > { %v1898_v14 = vmul.f32 1.442695, %v1893_v13 }
 0x724   : > { %v1888_v15 = vpop.xlane.xlu1 %1887 }
 0x725   : > { %3934 = vpow2.f32 %v1898_v14  ;;  %v1894_v16 = vsub.f32 %v1878_v45, %v1888_v15 }
 0x727   : > { %v1900_v17 = vmul.f32 1.442695, %v1894_v16 }
 0x728   : > { %v1891_v19 = vpop.xlane.xlu1 %1890 }
 0x729   : > { %3936 = vpow2.f32 %v1900_v17  ;;  %v1895_v20 = vsub.f32 %v1879_v52, %v1891_v19 }
 0x72b   : > { %v3933_v5 = vpop.eup %3932  ;;  %v1902_v6 = vmul.f32 1.442695, %v1895_v20 }
 0x72c   : > { %v1923_v9 = vpop.permute.xlu1 %1922  ;;  %v1904_v22 = vsel %vm1249_vm7, %v3933_v5, 0.0 }
 0x72d   : > { %3938 = vpow2.f32 %v1902_v6  ;;  %1905 = vadd.xlane.f32.xlu1 %v1904_v22  ;;  %3660 = vmatpush3.bf16.msra.mxu1 %v1923_v9 }
 0x72e   : > { %3671 = vmatprep.subr.bf16.mxu1 %v3848_v32 }
 0x72f   : > { %v3935_v1 = vpop.eup %3934 }
 0x730   : > { %v1907_v23 = vsel %vm1249_vm7, %v3935_v1, 0.0  ;;  %v1920_v3 = vpack.c.bf16 %v3935_v1, %v3933_v5  ;;  %v2096_v29 = vpop.permute.xlu1 %2095 }
 0x731   : > { %1908 = vadd.xlane.f32.xlu0 %v1907_v23  ;;  %v2101_v31 = vsel %vm1150_vm1, %v2096_v29, 0 }
 0x732   : > { %3662 = vmatmul.mubr.msk.bf16.vlgmr.msra.gmra.mrb[24].mxu1 %vm1249_vm7, %v1920_v3 }
 0x733   : > { %v3937_v27 = vpop.eup %3936  ;;  %3672 = vmatpush3.bf16.msra.mxu1 %v3848_v32 }
 0x734   : > { %v1910_v28 = vsel %vm1249_vm7, %v3937_v27, 0.0  ;;  %3673 = vmatprep.subr.bf16.mxu1 %v3849_v33 }
 0x735   : > { %1911 = vadd.xlane.f32.xlu1 %v1910_v28 }
 0x737   : > { %v3939_v24 = vpop.eup %3938  ;;  %3674 = vmatpush3.bf16.msra.mxu1 %v3849_v33 }
 0x738   : > { %v1913_v25 = vsel %vm1249_vm7, %v3939_v24, 0.0  ;;  %v1921_v30 = vpack.c.bf16 %v3939_v24, %v3937_v27  ;;  %3685 = vmatprep.subr.bf16.mxu1 %v4192_v18 }
 0x739   : > { %1914 = vadd.xlane.f32.xlu0 %v1913_v25 }
 0x73a   : > { %3668 = vmatmul.mubr.msk.bf16.vlgmr.msra.gmra.mrb[32].mxu0 %vm1249_vm7, %v1921_v30 }
 0x73b   : > { %3680 = vmatpush3.bf16.xpose.msra.mxu0 %v2101_v31  ;;  %3681 = vmatprep.mubr.msk.bf16.mxu0 %vm4193_vm0, %v4192_v18 }
 0x73c   : > { %3691 = vmatprep.subr.bf16.mxu0 %v4192_v18 }
 0x746   : > { %2093 = vrot.lane.b32.xlu1 %v4604_v39, %s4197_s24 }
 0x74a   : > { %2144 = vrot.lane.b32.xlu1 %v4615_v54, %s4197_s24 }
 0x74f   : > { %2146 = vrot.lane.b32.xlu0 %v4613_v53, %s4197_s24 }
 0x7ba   : > { %v1906_v34 = vpop.xlane.xlu1 %1905 }
 0x7bb   : > { %3940 = vrcp.f32 %v1906_v34 }
 0x7be   : > { %v1909_v39 = vpop.xlane.xlu0 %1908 }
 0x7bf   : > { %3942 = vrcp.f32 %v1909_v39 }
 0x7c2   : > { %v1912_v35 = vpop.xlane.xlu1 %1911 }
 0x7c3   : > { %3944 = vrcp.f32 %v1912_v35 }
 0x7c5   : > { %v3941_v38 = vpop.eup %3940 }
 0x7c6   : > { %v2094_v36 = vpop.permute.xlu1 %2093  ;;  %v1915_v53 = vpop.xlane.xlu0 %1914 }
 0x7c7   : > { %3682 = vmatmul.mubr.msk.bf16.vlgmr.msra.gmra.mrb[36].mxu0 %vm1150_vm1, %v2094_v36  ;;  %3946 = vrcp.f32 %v1915_v53 }
 0x7c8   : > { %3693 = vmatprep.mubr.msk.bf16.mxu0 %vm4193_vm0, %v4192_v18 }
 0x7c9   : > { %v3943_v41 = vpop.eup %3942 }
 0x7ca   : > { %v2147_v0 = vpop.permute.xlu0 %2146  ;;  %v2145_v10 = vpop.permute.xlu1 %2144 }
 0x7cb   : > { %v2152_v7 = vsel %vm1150_vm1, %v2147_v0, 0 }
 0x7cd   : > { %v3945_v52 = vpop.eup %3944 }
 0x7d1   : > { %v3947_v59 = vpop.eup %3946 }
 0x805   : > { %v1962_v54 = vpop.f32.mrb[24].mxu1 }
 0x806   : > { %v3663_v40 = vpop.f32.mrb[25].mxu1  ;;  %v2016_v45 = vmul.f32 %v3941_v38, %v1962_v54  ;;  %v3850_v54 = vld [vmem:[%s4459_s26 + $0x30] sm:$0xff]   ;;  %v3851_v38 = vld [vmem:[%s4459_s26 + $0x38] sm:$0xff]  }
 0x807   : > { %v1965_v42 = vpop.f32.mrb[26].mxu1 }
 0x808   : > { %v2017_v47 = vmul.f32 %v3943_v41, %v1965_v42  ;;  %v3664_v48 = vpop.f32.mrb[27].mxu1 }
 0x80a   : > { %v2020_v50 = vpack.c.bf16 %v2017_v47, %v2016_v45 }
 0x80c   : > { %3675 = vmatprep.mubr.msk.bf16.mxu1 %vm1150_vm1, %v2020_v50 }
 0x80d   : > { %v2009_v55 = vpop.f32.mrb[32].mxu0 }
 0x80e   : > { %v2018_v56 = vmul.f32 %v3945_v52, %v2009_v55  ;;  %v3669_v57 = vpop.f32.mrb[33].mxu0 }
 0x80f   : > { %v2012_v61 = vpop.f32.mrb[34].mxu0 }
 0x810   : > { %v2019_v62 = vmul.f32 %v3947_v59, %v2012_v61  ;;  %v3670_v63 = vpop.f32.mrb[35].mxu0 }
 0x812   : > { %v2021_v2 = vpack.c.bf16 %v2019_v62, %v2018_v56 }
 0x814   : > { %3676 = vmatmul.mubr.msk.bf16.vlgmr.msra.gmra.mrb[20].mxu1 %vm1150_vm1, %v2021_v2 }
 0x815   : > { %3686 = vmatpush3.bf16.xpose.msra.mxu1 %v2152_v7  ;;  %3687 = vmatprep.mubr.msk.bf16.mxu1 %vm4193_vm0, %v4192_v18 }
 0x816   : > { %3697 = vmatprep.subr.bf16.mxu1 %v4192_v18 }
 0x81c   : > { %3688 = vmatmul.mubr.msk.bf16.vlgmr.msra.gmra.mrb[28].mxu1 %vm1150_vm1, %v2145_v10 }
 0x81d   : > { %3699 = vmatprep.mubr.msk.bf16.mxu1 %vm4193_vm0, %v4192_v18 }
 0x89a   : > { %v2137_v11 = vpop.f32.mrb[36].mxu0 }
 0x89b   : > { %v2195_v37 = vsel %vm4635_vm4, %v2137_v11, -1e+09  ;;  %v3683_v49 = vpop.f32.mrb[37].mxu0 }
 0x89c   : > { %v2140_v12 = vpop.f32.mrb[38].mxu0  ;;  %v2199_v51 = vsel %vm1249_vm7, %v2195_v37, -inf }
 0x89d   : > { %v2196_v13 = vsel %vm4641_vm6, %v2140_v12, -1e+09  ;;  %2200 = vmax.xlane.f32.xlu0 %v2199_v51  ;;  %v3684_v14 = vpop.f32.mrb[39].mxu0  ;;  %v3415_v51 = vld [vmem:[%s5166_s15] ss:$0 sm:$0xff] }
 0x89e   : > { %v2202_v15 = vsel %vm1249_vm7, %v2196_v13, -inf  ;;  %v3988_v14 = vld [vmem:[#allocation2] sm:$0xff] }
 0x89f   : > { %2203 = vmax.xlane.f32.xlu1 %v2202_v15 }
 0x8b0   : > { %2241 = vrot.lane.b32.xlu1 %v4610_v46, %s4197_s24 }
 0x8ef   : > { %v2188_v18 = vpop.f32.mrb[28].mxu1 }
 0x8f0   : > { %v2197_v58 = vsel %vm4650_vm9, %v2188_v18, -1e+09  ;;  %v3689_v16 = vpop.f32.mrb[29].mxu1 }
 0x8f1   : > { %v2191_v17 = vpop.f32.mrb[30].mxu1  ;;  %v2205_v19 = vsel %vm1249_vm7, %v2197_v58, -inf  ;;  %v3989_v16 = vld [vmem:[#allocation2 + $0x10] sm:$0xff] }
 0x8f2   : > { %v2198_v60 = vsel %vm4657_vm10, %v2191_v17, -1e+09  ;;  %2206 = vmax.xlane.f32.xlu0 %v2205_v19  ;;  %v3690_v20 = vpop.f32.mrb[31].mxu1 }
 0x8f3   : > { %v2208_v5 = vsel %vm1249_vm7, %v2198_v60, -inf }
 0x8f6   : > { %2209 = vmax.xlane.f32.xlu0 %v2208_v5  ;;  %v3991_v5 = vld [vmem:[#allocation2 + $0x18] sm:$0xff] }
 0x90c   : > { %2288 = vrot.lane.b32.xlu0 %v4608_v44, %s4197_s24 }
 0x92a   : > { %v2201_v46 = vpop.xlane.xlu0 %2200 }
 0x92b   : > { %v2211_v6 = vsub.f32 %v2195_v37, %v2201_v46 }
 0x92c   : > { %v2204_v9 = vpop.xlane.xlu1 %2203 }
 0x92d   : > { %v2215_v4 = vmul.f32 1.442695, %v2211_v6  ;;  %v2212_v22 = vsub.f32 %v2196_v13, %v2204_v9 }
 0x92f   : > { %3948 = vpow2.f32 %v2215_v4  ;;  %v2217_v1 = vmul.f32 1.442695, %v2212_v22  ;;  %v3852_v22 = vld [vmem:[%s4466_s23] ss:$8 sps:$4 sm:$0xff]  }
 0x930   : > { %v2242_v23 = vpop.permute.xlu1 %2241 }
 0x931   : > { %3950 = vpow2.f32 %v2217_v1  ;;  %3692 = vmatpush3.bf16.msra.mxu0 %v2242_v23  ;;  %v3854_v1 = vld [vmem:[%s4466_s23 + $0x4] ss:$8 sps:$4 sm:$0xff]   ;;  %v3857_v23 = vld [vmem:[%s4466_s23 + $0x14] ss:$8 sps:$4 sm:$0xff]  }
 0x932   : > { %2603 = vmatprep.subr.bf16.mxu0 %v3854_v1 }
 0x939   : > { %v3949_v8 = vpop.eup %3948 }
 0x93a   : > { %v2223_v3 = vsel %vm1249_vm7, %v3949_v8, 0.0 }
 0x93b   : > { %v3951_v27 = vpop.eup %3950  ;;  %2224 = vadd.xlane.f32.xlu1 %v2223_v3 }
 0x93c   : > { %v2226_v28 = vsel %vm1249_vm7, %v3951_v27, 0.0  ;;  %v2239_v24 = vpack.c.bf16 %v3951_v27, %v3949_v8  ;;  %v3855_v8 = vld [vmem:[%s4466_s23 + $0x10] ss:$8 sps:$4 sm:$0xff]  }
 0x93d   : > { %2227 = vadd.xlane.f32.xlu0 %v2226_v28 }
 0x93e   : > { %3694 = vmatmul.mubr.msk.bf16.vlgmr.msra.gmra.mrb[40].mxu0 %vm1249_vm7, %v2239_v24 }
 0x93f   : > { %2635 = vmatprep.mubr.bf16.mxu0 %v4191_v43  ;;  %2604 = vmatpush1.bf16.msra.mxu0 %v3852_v22 }
 0x940   : > { %2605 = vmatprep.subr.bf16.mxu0 %v3857_v23 }
 0x943   : > { %2606 = vmatpush1.bf16.msra.mxu0 %v3855_v8 }
 0x97f   : > { %v2207_v44 = vpop.xlane.xlu0 %2206 }
 0x980   : > { %v2213_v29 = vsub.f32 %v2197_v58, %v2207_v44 }
 0x982   : > { %v2219_v25 = vmul.f32 1.442695, %v2213_v29 }
 0x983   : > { %v2210_v30 = vpop.xlane.xlu0 %2209 }
 0x984   : > { %3952 = vpow2.f32 %v2219_v25  ;;  %v2214_v31 = vsub.f32 %v2198_v60, %v2210_v30  ;;  %v3990_v60 = vld [vmem:[#allocation2 + $0x8] sm:$0xff] }
 0x986   : > { %v2221_v32 = vmul.f32 1.442695, %v2214_v31 }
 0x987   : > { %v2289_v33 = vpop.permute.xlu0 %2288 }
 0x988   : > { %3954 = vpow2.f32 %v2221_v32  ;;  %3698 = vmatpush3.bf16.msra.mxu1 %v2289_v33 }
 0x989   : > { %3703 = vmatprep.subr.bf16.mxu1 %v3850_v54 }
 0x98e   : > { %v3953_v34 = vpop.eup %3952 }
 0x98f   : > { %v2229_v35 = vsel %vm1249_vm7, %v3953_v34, 0.0 }
 0x990   : > { %2230 = vadd.xlane.f32.xlu1 %v2229_v35 }
 0x992   : > { %v3955_v36 = vpop.eup %3954 }
 0x993   : > { %v2232_v39 = vsel %vm1249_vm7, %v3955_v36, 0.0  ;;  %v2240_v53 = vpack.c.bf16 %v3955_v36, %v3953_v34 }
 0x994   : > { %2233 = vadd.xlane.f32.xlu0 %v2232_v39 }
 0x995   : > { %3700 = vmatmul.mubr.msk.bf16.vlgmr.msra.gmra.mrb[32].mxu1 %vm1249_vm7, %v2240_v53 }
 0x996   : > { %3704 = vmatpush3.bf16.msra.mxu1 %v3850_v54  ;;  %v3860_v54 = vld [vmem:[%s4466_s23 + $0x24] ss:$8 sps:$4 sm:$0xff]  }
 0x997   : > { %3705 = vmatprep.subr.bf16.mxu1 %v3851_v38  ;;  %2607 = vmatprep.subr.bf16.mxu0 %v3860_v54  ;;  %v3890_v54 = vld [vmem:[%s4512_s2 + $0x78] sm:$0xff]  }
 0x99a   : > { %3706 = vmatpush3.bf16.msra.mxu1 %v3851_v38  ;;  %v3858_v38 = vld [vmem:[%s4466_s23 + $0x20] ss:$8 sps:$4 sm:$0xff]  }
 0x99b   : > { %2608 = vmatpush1.bf16.msra.mxu0 %v3858_v38  ;;  %v3891_v38 = vld [vmem:[%s4512_s2 + $0x38] sm:$0xff]  }
 0x9c8   : > { %v2225_v40 = vpop.xlane.xlu1 %2224 }
 0x9c9   : > { %3956 = vrcp.f32 %v2225_v40  ;;  %v3863_v40 = vld [vmem:[%s4466_s23 + $0x34] ss:$8 sps:$4 sm:$0xff]  }
 0x9ca   : > { %v2228_v41 = vpop.xlane.xlu0 %2227  ;;  %2609 = vmatprep.subr.bf16.mxu0 %v3863_v40  ;;  %v2511_v40 = vld [vmem:[%s4494_s17] sm:$0x3]  ;;  %s5167_s17 = scalar_lea.vmem %s5113_s8, %s4474_s1 }
 0x9cb   : > { %3958 = vrcp.f32 %v2228_v41  ;;  %v3861_v41 = vld [vmem:[%s4466_s23 + $0x30] ss:$8 sps:$4 sm:$0xff]  }
 0x9cc   : > { %2610 = vmatpush1.bf16.msra.mxu0 %v3861_v41  ;;  %v2519_v41 = vsub.s32 1, %v4591_v21 }
 0x9d3   : > { %v3957_v45 = vpop.eup %3956 }
 0x9d5   : > { %v3959_v48 = vpop.eup %3958 }
 0xa11   : > { %v2281_v42 = vpop.f32.mrb[40].mxu0 }
 0xa12   : > { %v3695_v47 = vpop.f32.mrb[41].mxu0  ;;  %v2335_v52 = vmul.f32 %v3957_v45, %v2281_v42  ;;  %v3866_v42 = vld [vmem:[%s4466_s23 + $0x44] ss:$8 sps:$4 sm:$0xff]   ;;  %v3864_v45 = vld [vmem:[%s4466_s23 + $0x40] ss:$8 sps:$4 sm:$0xff]  }
 0xa13   : > { %v2284_v50 = vpop.f32.mrb[42].mxu0  ;;  %2611 = vmatprep.subr.bf16.mxu0 %v3866_v42  ;;  %v3869_v47 = vld [vmem:[%s4466_s23 + $0x54] ss:$8 sps:$4 sm:$0xff]   ;;  %v2516_v42 = vrot.slane %v2511_v40, %v4598_v26 }
 0xa14   : > { %v2336_v55 = vmul.f32 %v3959_v48, %v2284_v50  ;;  %v3696_v56 = vpop.f32.mrb[43].mxu0  ;;  %2612 = vmatpush1.bf16.msra.mxu0 %v3864_v45  ;;  %v3867_v48 = vld [vmem:[%s4466_s23 + $0x50] ss:$8 sps:$4 sm:$0xff]   ;;  %v3872_v50 = vld [vmem:[%s4466_s23 + $0x64] ss:$8 sps:$4 sm:$0xff]   ;;  %v2520_v45 = vrot.slane %v2511_v40, %v2519_v41 }
 0xa15   : > { %2613 = vmatprep.subr.bf16.mxu0 %v3869_v47  ;;  %v3873_v56 = vld [vmem:[%s4466_s23 + $0x70] ss:$8 sps:$4 sm:$0xff]  }
 0xa16   : > { %v2339_v57 = vpack.c.bf16 %v2336_v55, %v2335_v52  ;;  %v3870_v52 = vld [vmem:[%s4466_s23 + $0x60] ss:$8 sps:$4 sm:$0xff]   ;;  %v3875_v55 = vld [vmem:[%s4466_s23 + $0x74] ss:$8 sps:$4 sm:$0xff]  }
 0xa18   : > { %3707 = vmatprep.mubr.msk.bf16.mxu1 %vm1150_vm1, %v2339_v57  ;;  %2614 = vmatpush1.bf16.msra.mxu0 %v3867_v48 }
 0xa19   : > { %2615 = vmatprep.subr.bf16.mxu0 %v3872_v50 }
 0xa1c   : > { %2616 = vmatpush1.bf16.msra.mxu0 %v3870_v52 }
 0xa1d   : > { %v2231_v59 = vpop.xlane.xlu1 %2230  ;;  %2617 = vmatprep.subr.bf16.mxu0 %v3875_v55 }
 0xa1e   : > { %3960 = vrcp.f32 %v2231_v59 }
 0xa20   : > { %2618 = vmatpush1.bf16.msra.mxu0 %v3873_v56 }
 0xa21   : > { %v2234_v61 = vpop.xlane.xlu0 %2233 }
 0xa22   : > { %3962 = vrcp.f32 %v2234_v61 }
 0xa28   : > { %v3961_v63 = vpop.eup %3960 }
 0xa2c   : > { %v3963_v2 = vpop.eup %3962 }
 0xa68   : > { %v2328_v62 = vpop.f32.mrb[32].mxu1 }
 0xa69   : > { %v3701_v0 = vpop.f32.mrb[33].mxu1  ;;  %v2337_v10 = vmul.f32 %v3961_v63, %v2328_v62 }
 0xa6a   : > { %v2331_v7 = vpop.f32.mrb[34].mxu1 }
 0xa6b   : > { %v2338_v11 = vmul.f32 %v3963_v2, %v2331_v7  ;;  %v3702_v37 = vpop.f32.mrb[35].mxu1 }
 0xa6d   : > { %v2340_v49 = vpack.c.bf16 %v2338_v11, %v2337_v10 }
 0xa6f   : > { %3708 = vmatmul.mubr.msk.bf16.vlgmr.msra.gmra.mrb[20].mxu1 %vm1150_vm1, %v2340_v49 }
 0xb42   : > { %v3709_v12 = vpop.f32.mrb[20].mxu1 }
 0xb43   : > { %v2393_v13 = vpop.f32.mrb[21].mxu1  ;;  %v2414_v17 = vadd.f32 %v3989_v16, %v3709_v12  ;;  %v3417_v16 = vld [vmem:[%s725_s5] ss:$0 sm:$0xff] }
 0xb44   : > { %v2412_v15 = vadd.f32 %v3988_v14, %v2393_v13  ;;  %v3710_v18 = vpop.f32.mrb[22].mxu1 }
 0xb45   : > { %v2396_v58 = vpop.f32.mrb[23].mxu1  ;;  %v2415_v46 = vadd.f32 %v3991_v5, %v3710_v18  ;;  %v4872_v9 = vadd.f32 %v3415_v51, %v2414_v17 }
 0xb46   : > { %v4867_v19 = vadd.f32 %v3415_v51, %v2412_v15  ;;  %v2413_v20 = vadd.f32 %v3990_v60, %v2396_v58 }
 0xb47   : > { %v4875_v4 = vadd.f32 %v3415_v51, %v2415_v46 }
 0xb48   : > { %v4869_v6 = vadd.f32 %v3415_v51, %v2413_v20  ;;  %2427 = vadd.xlane.f32.xlu1 %v4867_v19  ;;  %v3416_v51 = vld [vmem:[%s722_s16] ss:$0 sm:$0xff] }
 0xb4a   : > { %2429 = vadd.xlane.f32.xlu0 %v4869_v6 }
 0xb4c   : > { %2431 = vadd.xlane.f32.xlu1 %v4872_v9 }
 0xb4e   : > { %2433 = vadd.xlane.f32.xlu0 %v4875_v4 }
 0xbd5   : > { %v2428_v3 = vpop.xlane.xlu1 %2427 }
 0xbd6   : > { %v2435_v27 = vmul.f32 0.0078125, %v2428_v3 }
 0xbd7   : > { %v2430_v28 = vpop.xlane.xlu0 %2429 }
 0xbd8   : > { %v2439_v24 = vsub.f32 %v4867_v19, %v2435_v27  ;;  %v2436_v44 = vmul.f32 0.0078125, %v2430_v28 }
 0xbd9   : > { %v2432_v29 = vpop.xlane.xlu1 %2431 }
 0xbda   : > { %v2440_v25 = vsub.f32 %v4869_v6, %v2436_v44  ;;  %v2437_v30 = vmul.f32 0.0078125, %v2432_v29  ;;  %v2443_v31 = vmul.f32 %v2439_v24, %v2439_v24  ;;  %v3877_v44 = vld [vmem:[%s4512_s2] sm:$0xff]   ;;  %v3878_v29 = vld [vmem:[%s4512_s2 + $0x48] sm:$0xff]  }
 0xbdb   : > { %v2434_v32 = vpop.xlane.xlu0 %2433 }
 0xbdc   : > { %v2441_v33 = vsub.f32 %v4872_v9, %v2437_v30  ;;  %v2438_v34 = vmul.f32 0.0078125, %v2434_v32  ;;  %2447 = vadd.xlane.f32.xlu1 %v2443_v31  ;;  %v2444_v35 = vmul.f32 %v2440_v25, %v2440_v25  ;;  %v3880_v30 = vld [vmem:[%s4512_s2 + $0x50] sm:$0xff]   ;;  %v3882_v31 = vld [vmem:[%s4512_s2 + $0x58] sm:$0xff]  }
 0xbdd   : > { %v3883_v32 = vld [vmem:[%s4512_s2 + $0x18] sm:$0xff]  }
 0xbde   : > { %v2442_v36 = vsub.f32 %v4875_v4, %v2438_v34  ;;  %2449 = vadd.xlane.f32.xlu0 %v2444_v35  ;;  %v2445_v39 = vmul.f32 %v2441_v33, %v2441_v33  ;;  %v3885_v34 = vld [vmem:[%s4512_s2 + $0x20] sm:$0xff]   ;;  %v3886_v35 = vld [vmem:[%s4512_s2 + $0x68] sm:$0xff]  }
 0xbe0   : > { %2451 = vadd.xlane.f32.xlu1 %v2445_v39  ;;  %v2446_v53 = vmul.f32 %v2442_v36, %v2442_v36  ;;  %v3888_v39 = vld [vmem:[%s4512_s2 + $0x70] sm:$0xff]  }
 0xbe2   : > { %2453 = vadd.xlane.f32.xlu0 %v2446_v53  ;;  %v3889_v53 = vld [vmem:[%s4512_s2 + $0x30] sm:$0xff]  }
 0xc69   : > { %v2448_v57 = vpop.xlane.xlu1 %2447 }
 0xc6a   : > { %v2455_v59 = vmul.f32 0.0078125, %v2448_v57 }
 0xc6b   : > { %v2450_v61 = vpop.xlane.xlu0 %2449 }
 0xc6c   : > { %v2459_v62 = vadd.f32 1e-05, %v2455_v59  ;;  %v2456_v63 = vmul.f32 0.0078125, %v2450_v61 }
 0xc6d   : > { %v2452_v0 = vpop.xlane.xlu1 %2451 }
 0xc6e   : > { %3964 = vrsqrt.f32 %v2459_v62  ;;  %v2460_v2 = vadd.f32 1e-05, %v2456_v63  ;;  %v2457_v7 = vmul.f32 0.0078125, %v2452_v0 }
 0xc6f   : > { %v2454_v10 = vpop.xlane.xlu0 %2453 }
 0xc70   : > { %3966 = vrsqrt.f32 %v2460_v2  ;;  %v2461_v11 = vadd.f32 1e-05, %v2457_v7  ;;  %v2458_v37 = vmul.f32 0.0078125, %v2454_v10 }
 0xc72   : > { %3968 = vrsqrt.f32 %v2461_v11  ;;  %v2462_v49 = vadd.f32 1e-05, %v2458_v37 }
 0xc74   : > { %3970 = vrsqrt.f32 %v2462_v49 }
 0xc78   : > { %v3965_v12 = vpop.eup %3964 }
 0xc79   : > { %v2467_v13 = vmul.f32 %v3965_v12, %v2439_v24  ;;  %v3876_v24 = vld [vmem:[%s4512_s2 + $0x40] sm:$0xff]  }
 0xc7a   : > { %v3967_v14 = vpop.eup %3966  ;;  %3535 = vmatprep.subr.bf16.mxu1 %v3876_v24 }
 0xc7b   : > { %v2468_v15 = vmul.f32 %v3967_v14, %v2440_v25  ;;  %v2478_v18 = vmul.f32 %v3416_v51, %v2467_v13  ;;  %3536 = vmatpush3.bf16.msra.mxu1 %v3877_v44  ;;  %v3879_v25 = vld [vmem:[%s4512_s2 + $0x8] sm:$0xff]  }
 0xc7c   : > { %v3969_v58 = vpop.eup %3968  ;;  %3537 = vmatprep.subr.bf16.mxu1 %v3878_v29 }
 0xc7d   : > { %v2479_v17 = vmul.f32 %v3416_v51, %v2468_v15  ;;  %v2489_v20 = vadd.f32 %v3417_v16, %v2478_v18  ;;  %v2469_v46 = vmul.f32 %v3969_v58, %v2441_v33  ;;  %v3884_v33 = vld [vmem:[%s4512_s2 + $0x60] sm:$0xff]  }
 0xc7e   : > { %v3971_v60 = vpop.eup %3970 }
 0xc7f   : > { %v2490_v5 = vadd.f32 %v3417_v16, %v2479_v17  ;;  %v2470_v22 = vmul.f32 %v3971_v60, %v2442_v36  ;;  %v2480_v8 = vmul.f32 %v3416_v51, %v2469_v46  ;;  %3538 = vmatpush3.bf16.msra.mxu1 %v3879_v25  ;;  %v3887_v36 = vld [vmem:[%s4512_s2 + $0x28] sm:$0xff]  }
 0xc80   : > { %3539 = vmatprep.subr.bf16.mxu1 %v3880_v30 }
 0xc81   : > { %v2493_v1 = vpack.c.bf16 %v2490_v5, %v2489_v20  ;;  %v2481_v23 = vmul.f32 %v3416_v51, %v2470_v22  ;;  %v2491_v27 = vadd.f32 %v3417_v16, %v2480_v8 }
 0xc83   : > { %2636 = vmatmul.mubr.bf16.vlgmr.msra.gmra.mrb[44].mxu0 %v2493_v1  ;;  %v2492_v3 = vadd.f32 %v3417_v16, %v2481_v23 }
 0xc84   : > { %2645 = vmatprep.mubr.bf16.mxu0 %v4191_v43  ;;  %v3881_v43 = vld [vmem:[%s4512_s2 + $0x10] sm:$0xff]   ;;  %s5170_s2 = sld [smem:[#allocation24_spill]] (!%p3451_p7) }
 0xc85   : > { %v2494_v28 = vpack.c.bf16 %v2492_v3, %v2491_v27  ;;  %3540 = vmatpush3.bf16.msra.mxu1 %v3881_v43 }
 0xc86   : > { %3541 = vmatprep.subr.bf16.mxu1 %v3882_v31 }
 0xc89   : > { %3542 = vmatpush3.bf16.msra.mxu1 %v3883_v32 }
 0xc8a   : > { %3543 = vmatprep.subr.bf16.mxu1 %v3884_v33 }
 0xc8b   : > { %2646 = vmatmul.mubr.bf16.gmra.mrb[48].mxu0 %v2494_v28 }
 0xc8d   : > { %3544 = vmatpush3.bf16.msra.mxu1 %v3885_v34 }
 0xc8e   : > { %3545 = vmatprep.subr.bf16.mxu1 %v3886_v35 }
 0xc91   : > { %3546 = vmatpush3.bf16.msra.mxu1 %v3887_v36 }
 0xc92   : > { %3547 = vmatprep.subr.bf16.mxu1 %v3888_v39 }
 0xc95   : > { %3548 = vmatpush3.bf16.msra.mxu1 %v3889_v53 }
 0xc96   : > { %3549 = vmatprep.subr.bf16.mxu1 %v3890_v54 }
 0xc99   : > { %3550 = vmatpush3.bf16.msra.mxu1 %v3891_v38 }
 0xd56   : > { %v2637_v47 = vpop.f32.mrb[44].mxu0 }
 0xd57   : > { %v4929_v48 = vadd.f32 %v2637_v47, %v2516_v42  ;;  %v2639_v50 = vpop.f32.mrb[45].mxu0 }
 0xd58   : > { %v4931_v52 = vadd.f32 %v2639_v50, %v2520_v45  ;;  %v2641_v55 = vpop.f32.mrb[46].mxu0 }
 0xd59   : > { %v2656_v56 = vmul.f32 %v4929_v48, %v4929_v48  ;;  %v4935_v57 = vadd.f32 %v2641_v55, %v2516_v42  ;;  %v2643_v59 = vpop.f32.mrb[47].mxu0 }
 0xd5a   : > { %v2657_v61 = vmul.f32 %v4931_v52, %v4931_v52  ;;  %v4939_v21 = vadd.f32 %v2643_v59, %v2520_v45 }
 0xd5b   : > { %v2664_v26 = vmul.f32 %v2656_v56, %v4929_v48  ;;  %v2658_v62 = vmul.f32 %v4935_v57, %v4935_v57 }
 0xd5c   : > { %v2665_v63 = vmul.f32 %v2657_v61, %v4931_v52  ;;  %v2659_v0 = vmul.f32 %v4939_v21, %v4939_v21 }
 0xd5d   : > { %v2672_v2 = vmul.f32 0.044715, %v2664_v26  ;;  %v2666_v7 = vmul.f32 %v2658_v62, %v4935_v57 }
 0xd5e   : > { %v2673_v10 = vmul.f32 0.044715, %v2665_v63  ;;  %v2667_v11 = vmul.f32 %v2659_v0, %v4939_v21  ;;  %v2647_v37 = vpop.f32.mrb[48].mxu0 }
 0xd5f   : > { %v2680_v49 = vadd.f32 %v2672_v2, %v4929_v48  ;;  %v2674_v12 = vmul.f32 0.044715, %v2666_v7  ;;  %v4950_v51 = vadd.f32 %v2647_v37, %v2516_v42  ;;  %v2649_v13 = vpop.f32.mrb[49].mxu0 }
 0xd60   : > { %v2681_v14 = vadd.f32 %v2673_v10, %v4931_v52  ;;  %v2675_v15 = vmul.f32 0.044715, %v2667_v11  ;;  %v4953_v18 = vadd.f32 %v2649_v13, %v2520_v45  ;;  %v2651_v58 = vpop.f32.mrb[50].mxu0 }
 0xd61   : > { %v2688_v16 = vmul.f32 0.7978846, %v2680_v49  ;;  %v2682_v17 = vadd.f32 %v2674_v12, %v4935_v57  ;;  %v2660_v60 = vmul.f32 %v4950_v51, %v4950_v51  ;;  %v4958_v20 = vadd.f32 %v2651_v58, %v2516_v42  ;;  %v2653_v5 = vpop.f32.mrb[51].mxu0 }
 0xd62   : > { %v2689_v46 = vmul.f32 0.7978846, %v2681_v14  ;;  %v2683_v22 = vadd.f32 %v2675_v15, %v4939_v21  ;;  %v2661_v1 = vmul.f32 %v4953_v18, %v4953_v18  ;;  %v4963_v23 = vadd.f32 %v2653_v5, %v2520_v45 }
 0xd63   : > { %3972 = vtanh.f32 %v2688_v16  ;;  %v2690_v8 = vmul.f32 0.7978846, %v2682_v17  ;;  %v2668_v3 = vmul.f32 %v2660_v60, %v4950_v51  ;;  %v2662_v27 = vmul.f32 %v4958_v20, %v4958_v20 }
 0xd64   : > { %3974 = vtanh.f32 %v2689_v46  ;;  %v2691_v28 = vmul.f32 0.7978846, %v2683_v22  ;;  %v2669_v24 = vmul.f32 %v2661_v1, %v4953_v18  ;;  %v2663_v44 = vmul.f32 %v4963_v23, %v4963_v23 }
 0xd65   : > { %3976 = vtanh.f32 %v2690_v8  ;;  %v2676_v29 = vmul.f32 0.044715, %v2668_v3  ;;  %v2670_v25 = vmul.f32 %v2662_v27, %v4958_v20 }
 0xd66   : > { %3978 = vtanh.f32 %v2691_v28  ;;  %v2677_v30 = vmul.f32 0.044715, %v2669_v24  ;;  %v2671_v43 = vmul.f32 %v2663_v44, %v4963_v23  ;;  %v3450_v24 = vld [vmem:[%s5167_s17] ss:$0 sm:$0xff] }
 0xd67   : > { %v2684_v31 = vadd.f32 %v2676_v29, %v4950_v51  ;;  %v2678_v32 = vmul.f32 0.044715, %v2670_v25 }
 0xd68   : > { %v2685_v33 = vadd.f32 %v2677_v30, %v4953_v18  ;;  %v2679_v34 = vmul.f32 0.044715, %v2671_v43 }
 0xd69   : > { %v2692_v35 = vmul.f32 0.7978846, %v2684_v31  ;;  %v2686_v36 = vadd.f32 %v2678_v32, %v4958_v20 }
 0xd6a   : > { %v2693_v39 = vmul.f32 0.7978846, %v2685_v33  ;;  %v2687_v53 = vadd.f32 %v2679_v34, %v4963_v23 }
 0xd6b   : > { %3980 = vtanh.f32 %v2692_v35  ;;  %v2694_v54 = vmul.f32 0.7978846, %v2686_v36 }
 0xd6c   : > { %3982 = vtanh.f32 %v2693_v39  ;;  %v2695_v38 = vmul.f32 0.7978846, %v2687_v53 }
 0xd6d   : > { %v3973_v40 = vpop.eup %3972  ;;  %3984 = vtanh.f32 %v2694_v54 }
 0xd6e   : > { %v3975_v41 = vpop.eup %3974  ;;  %v2704_v42 = vadd.f32 1.0, %v3973_v40  ;;  %3986 = vtanh.f32 %v2695_v38 }
 0xd6f   : > { %v3977_v45 = vpop.eup %3976  ;;  %v2705_v47 = vadd.f32 1.0, %v3975_v41 }
 0xd70   : > { %v3979_v50 = vpop.eup %3978  ;;  %v2712_v55 = vmul.f32 0.5, %v2704_v42  ;;  %v2706_v56 = vadd.f32 1.0, %v3977_v45 }
 0xd71   : > { %v2707_v59 = vadd.f32 1.0, %v3979_v50  ;;  %v2713_v61 = vmul.f32 0.5, %v2705_v47 }
 0xd72   : > { %v2714_v26 = vmul.f32 0.5, %v2706_v56  ;;  %v2720_v63 = vmul.f32 %v2712_v55, %v4929_v48 }
 0xd73   : > { %v2715_v62 = vmul.f32 0.5, %v2707_v59  ;;  %v2721_v7 = vmul.f32 %v2713_v61, %v4931_v52 }
 0xd74   : > { %v2722_v0 = vmul.f32 %v2714_v26, %v4935_v57 }
 0xd75   : > { %v3981_v2 = vpop.eup %3980  ;;  %v2723_v10 = vmul.f32 %v2715_v62, %v4939_v21  ;;  %v3995_v62 = vld [vmem:[%s5168_s0 + $0x14] ss:$8 sps:$4 sm:$0xff] (!%p3451_p7)  }
 0xd76   : > { %v3983_v11 = vpop.eup %3982  ;;  %v2728_v37 = vpack.c.bf16 %v2722_v0, %v2720_v63  ;;  %v2708_v49 = vadd.f32 1.0, %v3981_v2  ;;  %v3997_v63 = vld [vmem:[%s5168_s0 + $0x10] ss:$8 sps:$4 sm:$0xff] (!%p3451_p7)   ;;  %v3998_v0 = vld [vmem:[%s5168_s0 + $0x24] ss:$8 sps:$4 sm:$0xff] (!%p3451_p7)  }
 0xd77   : > { %v3985_v12 = vpop.eup %3984  ;;  %v2729_v13 = vpack.c.bf16 %v2723_v10, %v2721_v7  ;;  %v2709_v14 = vadd.f32 1.0, %v3983_v11  ;;  %v4000_v2 = vld [vmem:[%s5168_s0 + $0x20] ss:$8 sps:$4 sm:$0xff] (!%p3451_p7)   ;;  %v4001_v7 = vld [vmem:[%s5168_s0 + $0x34] ss:$8 sps:$4 sm:$0xff] (!%p3451_p7)  }
 0xd78   : > { %v3987_v15 = vpop.eup %3986  ;;  %v2710_v58 = vadd.f32 1.0, %v3985_v12  ;;  %v2716_v16 = vmul.f32 0.5, %v2708_v49  ;;  %v4003_v10 = vld [vmem:[%s5168_s0 + $0x30] ss:$8 sps:$4 sm:$0xff] (!%p3451_p7)   ;;  %v4004_v11 = vld [vmem:[%s5168_s0 + $0x44] ss:$8 sps:$4 sm:$0xff] (!%p3451_p7)  }
 0xd79   : > { %2892 = vmatprep.mubr.bf16.mxu1 %v2729_v13  ;;  %v2711_v17 = vadd.f32 1.0, %v3987_v15  ;;  %v2717_v60 = vmul.f32 0.5, %v2709_v14  ;;  %v4007_v49 = vld [vmem:[%s5168_s0 + $0x54] ss:$8 sps:$4 sm:$0xff] (!%p3451_p7)   ;;  %v4009_v12 = vld [vmem:[%s5168_s0 + $0x50] ss:$8 sps:$4 sm:$0xff] (!%p3451_p7)  }
 0xd7a   : > { %2893 = vmatmul.mubr.bf16.vlgmr.msra.gmra.mrb[36].mxu1 %v2728_v37  ;;  %v2718_v48 = vmul.f32 0.5, %v2710_v58  ;;  %v2724_v52 = vmul.f32 %v2716_v16, %v4950_v51  ;;  %v4006_v37 = vld [vmem:[%s5168_s0 + $0x40] ss:$8 sps:$4 sm:$0xff] (!%p3451_p7)   ;;  %v4010_v13 = vld [vmem:[%s5168_s0 + $0x64] ss:$8 sps:$4 sm:$0xff] (!%p3451_p7)   ;;  %v4198_v14 = vmov (!%p3451_p7), 0  }
 0xd7b   : > { %v2719_v57 = vmul.f32 0.5, %v2711_v17  ;;  %v2725_v5 = vmul.f32 %v2717_v60, %v4953_v18  ;;  %3128 = vmatprep.mubr.bf16.mxu0 (!%p3451_p7), %v4198_v14  ;;  %v4012_v15 = vld [vmem:[%s5168_s0 + $0x60] ss:$8 sps:$4 sm:$0xff] (!%p3451_p7)   ;;  %v4013_v58 = vld [vmem:[%s5168_s0 + $0x74] ss:$8 sps:$4 sm:$0xff] (!%p3451_p7)  }
 0xd7c   : > { %v2726_v21 = vmul.f32 %v2718_v48, %v4958_v20  ;;  %v4015_v16 = vld [vmem:[%s5168_s0 + $0x70] ss:$8 sps:$4 sm:$0xff] (!%p3451_p7)  }
 0xd7d   : > { %v2727_v46 = vmul.f32 %v2719_v57, %v4963_v23 }
 0xd7e   : > { %v2730_v22 = vpack.c.bf16 %v2726_v21, %v2724_v52 }
 0xd7f   : > { %v2731_v1 = vpack.c.bf16 %v2727_v46, %v2725_v5 }
 0xd81   : > { %2900 = vmatprep.mubr.bf16.mxu1 %v2731_v1 }
 0xd82   : > { %2901 = vmatmul.mubr.bf16.gmra.mrb[40].mxu1 %v2730_v22 }
 0xd83   : > { %3138 = vmatprep.mubr.bf16.mxu1 (!%p3451_p7), %v4198_v14 }
 0xe4d   : > { %v3551_v8 = vpop.f32.mrb[36].mxu1 }
 0xe4e   : > { %v3552_v3 = vpop.f32.mrb[37].mxu1 }
 0xe4f   : > { %v3553_v27 = vadd.f32 %v3552_v3, %v3551_v8  ;;  %v3554_v28 = vpop.f32.mrb[38].mxu1 }
 0xe50   : > { %v3555_v51 = vpop.f32.mrb[39].mxu1 }
 0xe51   : > { %v2909_v20 = vadd.f32 %v3553_v27, %v4867_v19  ;;  %v3556_v44 = vadd.f32 %v3555_v51, %v3554_v28 }
 0xe53   : > { %v2920_v18 = vadd.f32 %v3450_v24, %v2909_v20  ;;  %v2910_v23 = vadd.f32 %v3556_v44, %v4869_v6  ;;  %v3992_v6 = vld [vmem:[%s5168_s0 + $0x4] ss:$8 sps:$4 sm:$0xff] (!%p3451_p7)  }
 0xe54   : > { %3096 = vmatprep.subr.bf16.mxu0 (!%p3451_p7), %v3992_v6  ;;  %3723 = vmatprep.subr.bf16.mxu1 (!%p3451_p7), %v3992_v6 }
 0xe55   : > { %2924 = vst [vmem:[#allocation2] sm:$0xff] %v2920_v18  ;;  %v2921_v29 = vadd.f32 %v3450_v24, %v2910_v23  ;;  %v3557_v25 = vpop.f32.mrb[40].mxu1  ;;  %2932 = vadd.xlane.f32.xlu0 (!%p3451_p7), %v2920_v18  ;;  %v3453_v23 = vld [vmem:[%s5170_s2] ss:$0 sm:$0xff] (!%p3451_p7) }
 0xe56   : > { %v3558_v30 = vpop.f32.mrb[41].mxu1 }
 0xe57   : > { %2925 = vst [vmem:[#allocation2 + $0x8] sm:$0xff] %v2921_v29  ;;  %v3559_v43 = vadd.f32 %v3558_v30, %v3557_v25  ;;  %v3560_v31 = vpop.f32.mrb[42].mxu1 }
 0xe58   : > { %v3561_v32 = vpop.f32.mrb[43].mxu1 }
 0xe59   : > { %v2911_v33 = vadd.f32 %v3559_v43, %v4872_v9  ;;  %v3562_v34 = vadd.f32 %v3561_v32, %v3560_v31  ;;  %2931 = sbr.rel (%p3451_p7) target bundleno = 4210 (0x1072), region = 104  ;;  %2934 = vadd.xlane.f32.xlu0 (!%p3451_p7), %v2921_v29  ;;  %v3994_v9 = vld [vmem:[%s5168_s0] ss:$8 sps:$4 sm:$0xff] (!%p3451_p7)  }
 0xe5a   : > { %3097 = vmatpush1.bf16.msra.mxu0 (!%p3451_p7), %v3994_v9  ;;  %3731 = vmatpush1.bf16.msra.mxu1 (!%p3451_p7), %v3994_v9 }
 0xe5b   : > { %v2922_v35 = vadd.f32 %v3450_v24, %v2911_v33  ;;  %v2912_v36 = vadd.f32 %v3562_v34, %v4875_v4  ;;  %3098 = vmatprep.subr.bf16.mxu0 (!%p3451_p7), %v3995_v62  ;;  %3724 = vmatprep.subr.bf16.mxu1 (!%p3451_p7), %v3995_v62 }
 0xe5d   : > { %2926 = vst [vmem:[#allocation2 + $0x10] sm:$0xff] %v2922_v35  ;;  %v2923_v19 = vadd.f32 %v3450_v24, %v2912_v36  ;;  %2936 = vadd.xlane.f32.xlu1 (!%p3451_p7), %v2922_v35  ;;  %v3452_v24 = vld [vmem:[%s5169_s18] ss:$0 sm:$0xff] (!%p3451_p7) }
 0xe5e   : > { %3099 = vmatpush1.bf16.msra.mxu0 (!%p3451_p7), %v3997_v63  ;;  %3732 = vmatpush1.bf16.msra.mxu1 (!%p3451_p7), %v3997_v63 }
 0xe5f   : > { %2927 = vst [vmem:[#allocation2 + $0x18] sm:$0xff] %v2923_v19  ;;  %3100 = vmatprep.subr.bf16.mxu0 (!%p3451_p7), %v3998_v0  ;;  %3725 = vmatprep.subr.bf16.mxu1 (!%p3451_p7), %v3998_v0 }
 0xe61   : > { %2938 = vadd.xlane.f32.xlu1 %v2923_v19 }
 0xe62   : > { %3101 = vmatpush1.bf16.msra.mxu0 %v4000_v2  ;;  %3733 = vmatpush1.bf16.msra.mxu1 %v4000_v2 }
 0xe63   : > { %3102 = vmatprep.subr.bf16.mxu0 %v4001_v7  ;;  %3726 = vmatprep.subr.bf16.mxu1 %v4001_v7 }
 0xe66   : > { %3103 = vmatpush1.bf16.msra.mxu0 %v4003_v10  ;;  %3734 = vmatpush1.bf16.msra.mxu1 %v4003_v10 }
 0xe67   : > { %3104 = vmatprep.subr.bf16.mxu0 %v4004_v11  ;;  %3727 = vmatprep.subr.bf16.mxu1 %v4004_v11 }
 0xe6a   : > { %3105 = vmatpush1.bf16.msra.mxu0 %v4006_v37  ;;  %3735 = vmatpush1.bf16.msra.mxu1 %v4006_v37 }
 0xe6b   : > { %3106 = vmatprep.subr.bf16.mxu0 %v4007_v49  ;;  %3728 = vmatprep.subr.bf16.mxu1 %v4007_v49 }
 0xe6e   : > { %3107 = vmatpush1.bf16.msra.mxu0 %v4009_v12  ;;  %3736 = vmatpush1.bf16.msra.mxu1 %v4009_v12 }
 0xe6f   : > { %3108 = vmatprep.subr.bf16.mxu0 %v4010_v13  ;;  %3729 = vmatprep.subr.bf16.mxu1 %v4010_v13 }
 0xe72   : > { %3109 = vmatpush1.bf16.msra.mxu0 %v4012_v15  ;;  %3737 = vmatpush1.bf16.msra.mxu1 %v4012_v15 }
 0xe73   : > { %3110 = vmatprep.subr.bf16.mxu0 %v4013_v58  ;;  %3730 = vmatprep.subr.bf16.mxu1 %v4013_v58 }
 0xe76   : > { %3111 = vmatpush1.bf16.msra.mxu0 %v4015_v16  ;;  %3738 = vmatpush1.bf16.msra.mxu1 %v4015_v16 }
 0xee2   : > { %v2933_v4 = vpop.xlane.xlu0 %2932 }
 0xee3   : > { %v2940_v53 = vmul.f32 0.0078125, %v2933_v4 }
 0xee5   : > { %v5001_v38 = vsub.f32 %v2920_v18, %v2940_v53 }
 0xee6   : > { %v2935_v41 = vpop.xlane.xlu0 %2934 }
 0xee7   : > { %v2941_v45 = vmul.f32 0.0078125, %v2935_v41  ;;  %v2948_v47 = vmul.f32 %v5001_v38, %v5001_v38 }
 0xee9   : > { %v5007_v55 = vsub.f32 %v2921_v29, %v2941_v45  ;;  %2952 = vadd.xlane.f32.xlu0 %v2948_v47 }
 0xeea   : > { %v2937_v39 = vpop.xlane.xlu1 %2936 }
 0xeeb   : > { %v2942_v54 = vmul.f32 0.0078125, %v2937_v39  ;;  %v2949_v61 = vmul.f32 %v5007_v55, %v5007_v55 }
 0xeed   : > { %v5003_v40 = vsub.f32 %v2922_v35, %v2942_v54  ;;  %2954 = vadd.xlane.f32.xlu1 %v2949_v61 }
 0xeee   : > { %v2939_v42 = vpop.xlane.xlu1 %2938 }
 0xeef   : > { %v2943_v50 = vmul.f32 0.0078125, %v2939_v42  ;;  %v2950_v59 = vmul.f32 %v5003_v40, %v5003_v40 }
 0xef1   : > { %v5009_v56 = vsub.f32 %v2923_v19, %v2943_v50  ;;  %2956 = vadd.xlane.f32.xlu0 %v2950_v59 }
 0xef3   : > { %v2951_v26 = vmul.f32 %v5009_v56, %v5009_v56 }
 0xef5   : > { %2958 = vadd.xlane.f32.xlu1 %v2951_v26 }
 0xf76   : > { %v2953_v17 = vpop.xlane.xlu0 %2952 }
 0xf77   : > { %v2960_v60 = vmul.f32 0.0078125, %v2953_v17 }
 0xf79   : > { %v2964_v48 = vadd.f32 1e-05, %v2960_v60 }
 0xf7a   : > { %v2955_v57 = vpop.xlane.xlu1 %2954 }
 0xf7b   : > { %4016 = vrsqrt.f32 %v2964_v48  ;;  %v2961_v21 = vmul.f32 0.0078125, %v2955_v57 }
 0xf7d   : > { %v2965_v46 = vadd.f32 1e-05, %v2961_v21 }
 0xf7e   : > { %v2957_v52 = vpop.xlane.xlu0 %2956 }
 0xf7f   : > { %v2962_v5 = vmul.f32 0.0078125, %v2957_v52  ;;  %4018 = vrsqrt.f32 %v2965_v46 }
 0xf81   : > { %v2966_v22 = vadd.f32 1e-05, %v2962_v5 }
 0xf82   : > { %v2959_v1 = vpop.xlane.xlu1 %2958 }
 0xf83   : > { %v2963_v8 = vmul.f32 0.0078125, %v2959_v1  ;;  %4020 = vrsqrt.f32 %v2966_v22 }
 0xf85   : > { %v2967_v3 = vadd.f32 1e-05, %v2963_v8  ;;  %v4017_v27 = vpop.eup %4016 }
 0xf86   : > { %v2972_v28 = vmul.f32 %v4017_v27, %v5001_v38 }
 0xf87   : > { %4022 = vrsqrt.f32 %v2967_v3 }
 0xf88   : > { %v2983_v18 = vmul.f32 %v3452_v24, %v2972_v28 }
 0xf89   : > { %v4019_v51 = vpop.eup %4018 }
 0xf8a   : > { %v2973_v44 = vmul.f32 %v4019_v51, %v5007_v55  ;;  %v2994_v43 = vadd.f32 %v3453_v23, %v2983_v18 }
 0xf8c   : > { %v2984_v25 = vmul.f32 %v3452_v24, %v2973_v44 }
 0xf8d   : > { %v4021_v20 = vpop.eup %4020 }
 0xf8e   : > { %v2974_v29 = vmul.f32 %v4021_v20, %v5003_v40  ;;  %v2995_v31 = vadd.f32 %v3453_v23, %v2984_v25 }
 0xf90   : > { %v2985_v33 = vmul.f32 %v3452_v24, %v2974_v29  ;;  %v2998_v34 = vpack.c.bf16 %v2995_v31, %v2994_v43 }
 0xf91   : > { %v4023_v30 = vpop.eup %4022 }
 0xf92   : > { %v2975_v32 = vmul.f32 %v4023_v30, %v5009_v56  ;;  %3129 = vmatmul.mubr.bf16.vlgmr.msra.gmra.mrb[0].mxu0 %v2998_v34  ;;  %v2996_v36 = vadd.f32 %v3453_v23, %v2985_v33 }
 0xf94   : > { %v2986_v35 = vmul.f32 %v3452_v24, %v2975_v32 }
 0xf96   : > { %v2997_v19 = vadd.f32 %v3453_v23, %v2986_v35 }
 0xf98   : > { %v2999_v6 = vpack.c.bf16 %v2997_v19, %v2996_v36 }
 0xf9a   : > { %3139 = vmatmul.mubr.bf16.vlgmr.msra.gmra.mrb[0].mxu1 %v2999_v6 }
0x1065   : > { %v3130_v9 = vpop.f32.mrb[0].mxu0 }
0x1066   : > { %3149 = vst [vmem:[#allocation9] sm:$0xff] %v3130_v9  ;;  %v3132_v4 = vpop.f32.mrb[1].mxu0 }
0x1067   : > { %3150 = vst [vmem:[#allocation9 + $0x8] sm:$0xff] %v3132_v4  ;;  %v3134_v39 = vpop.f32.mrb[2].mxu0 }
0x1068   : > { %3151 = vst [vmem:[#allocation9 + $0x10] sm:$0xff] %v3134_v39  ;;  %v3136_v53 = vpop.f32.mrb[3].mxu0 }
0x1069   : > { %3152 = vst [vmem:[#allocation9 + $0x18] sm:$0xff] %v3136_v53 }
0x106d   : > { %v3140_v54 = vpop.f32.mrb[0].mxu1 }
0x106e   : > { %3153 = vst [vmem:[#allocation9 + $0x20] sm:$0xff] %v3140_v54  ;;  %v3142_v38 = vpop.f32.mrb[1].mxu1 }
0x106f   : > { %3154 = vst [vmem:[#allocation9 + $0x28] sm:$0xff] %v3142_v38  ;;  %v3144_v40 = vpop.f32.mrb[2].mxu1 }
0x1070   : > { %3155 = vst [vmem:[#allocation9 + $0x30] sm:$0xff] %v3144_v40  ;;  %v3146_v41 = vpop.f32.mrb[3].mxu1 }
0x1071   : > { %3156 = vst [vmem:[#allocation9 + $0x38] sm:$0xff] %v3146_v41 }
0x1072 PF: > { %p3761_p12 = scmp.eq.s32.totalorder %s4306_s25, 1  ;;  %s4199_s16 = smov [#allocation9]  }
0x1073   : > { %s3163_s17 = sshll.u32 %s4199_s16, 4  ;;  %s3164_s17 = int_to_ptr.vmem [resolvable:$true] %s3163_s17 }
0x1074   : > { %s4114_s1 = scalar_lea.vmem %s3164_s17, 1024  ;;  %p4121_p6 = scmp.lt.s32.totalorder %s3164_s17, %s3164_s17 }
0x1075   : > { %p4115_p2 = scmp.ne.s32.totalorder %s3164_s17, %s4114_s1  ;;  %p4122_p1 = scmp.lt.s32.totalorder %s4114_s1, %s4114_s1 }
0x1077   : > { %p4116_p3 = pnand %p4115_p2, %p3761_p12  ;;  %p4123_p4 = por %p4122_p1, %p4121_p6 }
0x1079   : > { %p4117_p5 = pneg %p4116_p3 }
0x107b   : > { %p4124_p11 = pnand %p4123_p4, %p4117_p5 }
0x107d   : > { %4127 = shalt.err (!%p4124_p11)
}
0x107e   : > { %s5171_s21 = sld [smem:[#allocation25_spill]] }
0x1084   : > { %s5172_s7 = smov %s5171_s21  ;;  %s4128_s29 = scalar_lea.hbm %s5171_s21, 1024 }
0x1085   : > { %p4129_p13 = scmp.ne.s32.totalorder %s5172_s7, %s4128_s29  ;;  %p4134_p8 = scmp.lt.u32.totalorder %s4128_s29, %s5172_s7 }
0x1087   : > { %p4130_p10 = pnand %p4129_p13, %p3761_p12 }
0x1089   : > { %p4131_p9 = pneg %p4130_p10 }
0x108b   : > { %p4136_p0 = pnand %p4134_p8, %p4131_p9 }
0x108d   : > { %4139 = shalt.err (!%p4136_p0)
}
0x108e   : > { %s4200_s26 = smov 256   ;;  %s4201_s14 = smov 16  }
0x108f   : > { %3747 = dma.vmem_to_hbm [thread:$0]  (%p3761_p12), %s3164_s17, 1024, %s5172_s7, [#allocation5], %s4200_s26, %s4200_s26, %s4201_s14  }
0x1090   : > { %4165 = dma.done.wait (%p3761_p12), [#allocation5], 1024  }
0x1091   : > { %4167 = vsyncadd (%p3761_p12), [#allocation5], 4294966272 }
0x1092 PF: > { %s5173_s24 = sld [smem:[#allocation14_spill]]  ;;  %s5174_s18 = sld [smem:[#allocation13_spill]] }
0x1093   : > { %s5175_s23 = sld [smem:[#allocation15_spill]]  ;;  %s5176_s21 = smov %s4174_s22 }
0x1098   : > { %p30_p7 = scmp.ge.s32.totalorder %s5173_s24, 4   ;;  %s5177_s22 = smov %s5174_s18 }
0x109a   :  { %32 = sbr.rel (!%p30_p7) target bundleno = 17 (0x11), region = 177 }
0x10a1   :  { %3179 = vsyncpa [#allocation4], 1 }
0x10a2   :  { %3181 = vsyncpa [#allocation4 + $0x1], 1 }
0x10a3   :  { %3182 = vsyncpa [#allocation7], 1 }
0x10a4   :  { %3184 = vsyncpa [#allocation7 + $0x1], 1 }
0x10a5   :  { %3185 = vsyncpa [#allocation5], 1 }
0x10a6   :  { %3187 = vsyncpa [#allocation5 + $0x1], 1 }

</bundles_post_ra>
